<compile_context>
chip_gen: v5e
topology: v5e:2x2
jax: 0.10.0
libtpu: 0.0.40
codegen_flags: <defaults>
</compile_context>

<pallas_src>
import functools

import jax
import jax.numpy as jnp
from jax.experimental import pallas as pl
from jax.experimental.pallas import tpu as pltpu


def _round_up(n, m):
    return ((n + m - 1) // m) * m


def _sane_kernel(
    # batch-tiled inputs
    x_ref, k_ref,
    # fused weights (VMEM-resident across grid steps)
    w1x_ref, w1k_ref, b1_ref,          # stage-1 fused: h.L1 | g2.L1 | g1.L1
    w2_ref, b2_ref,                    # stage-2 block-diag: h.L2 | g2.L2 | g1.L2
    wf1_ref, bf1_ref, wf2_ref, bf2_ref,  # f network
    # packed lane-dense output slab
    out_ref,
    *, h_dim, hid_g, y_dim, out_pad,
):
    xb = x_ref[...].astype(jnp.bfloat16)
    kb = k_ref[...].astype(jnp.bfloat16)

    # ---- Stage 1 (fused): first Linear of h / g.g2 / g.g1, then ReLU.
    # g1's k-contribution is folded into w1k (zero elsewhere), so no concat.
    t1 = (jnp.dot(xb, w1x_ref[...], preferred_element_type=jnp.float32)
          + jnp.dot(kb, w1k_ref[...], preferred_element_type=jnp.float32)
          + b1_ref[...])
    a1 = jnp.maximum(t1, 0.0).astype(jnp.bfloat16)

    # ---- Stage 2 (fused, block-diagonal): second Linear of h / g.g2 / g.g1.
    s2 = jnp.dot(a1, w2_ref[...], preferred_element_type=jnp.float32) + b2_ref[...]
    x_tilde = s2[:, 0:h_dim]
    k_tilde = s2[:, h_dim:2 * h_dim]
    z = s2[:, 2 * h_dim:2 * h_dim + hid_g]

    r = jax.nn.sigmoid(z)                    # exp on EUP
    rk_tilde = r * k_tilde                   # valid because hid_g == h_dim
    x_tilde_plus = x_tilde + rk_tilde

    # ---- f network: Linear -> ReLU -> Linear.
    tf1 = jnp.maximum(
        jnp.dot(x_tilde_plus.astype(jnp.bfloat16), wf1_ref[...],
                preferred_element_type=jnp.float32) + bf1_ref[...],
        0.0)
    yhat = jnp.dot(tf1.astype(jnp.bfloat16), wf2_ref[...],
                   preferred_element_type=jnp.float32) + bf2_ref[...]

    # ---- confidence: ck = ||rk||^2, cx = ||x_tilde||^2, c = ck / (ck + cx)
    ck = jnp.sum(rk_tilde * rk_tilde, axis=1, keepdims=True)
    cx = jnp.sum(x_tilde * x_tilde, axis=1, keepdims=True)
    c = ck * pl.reciprocal(ck + cx, approx=True)

    # ---- pack everything into one lane-dense (TB, out_pad) slab.
    tb = out_ref.shape[0]
    c_wide = jnp.broadcast_to(c, (tb, out_pad - y_dim - hid_g))
    out_ref[...] = jnp.concatenate([yhat, r, c_wide], axis=1)


def _prepare_fused(params, x_dim, k_dim, h_dim):
    """Fuse per-layer weights into the padded matrices the kernel expects."""
    f32, bf16 = jnp.float32, jnp.bfloat16
    hid_h = params["wh1"].shape[1]
    hid_g = params["wg1b"].shape[1]

    if hid_g != h_dim:
        raise ValueError("r * k_tilde requires hidden_g == h_dim "
                         f"(got hid_g={hid_g}, h_dim={h_dim})")

    n1 = hid_h + 2 * hid_g
    N1 = _round_up(n1, 128)
    n2 = 2 * h_dim + hid_g
    N2 = _round_up(n2, 128)

    wg1a = params["wg1a"]                 # (x_dim + k_dim, hid_g)
    wg1a_x, wg1a_k = wg1a[:x_dim], wg1a[x_dim:]

    o1, o2 = hid_h, hid_h + hid_g

    w1x = jnp.zeros((x_dim, N1), f32)
    w1x = w1x.at[:, 0:hid_h].set(params["wh1"])
    w1x = w1x.at[:, o1:o2].set(params["wg2a"])
    w1x = w1x.at[:, o2:o2 + hid_g].set(wg1a_x)

    w1k = jnp.zeros((k_dim, N1), f32)
    w1k = w1k.at[:, o2:o2 + hid_g].set(wg1a_k)

    b1 = jnp.zeros((1, N1), f32)
    b1 = b1.at[:, 0:hid_h].set(params["bh1"])
    b1 = b1.at[:, o1:o2].set(params["bg2a"])
    b1 = b1.at[:, o2:o2 + hid_g].set(params["bg1a"])

    w2 = jnp.zeros((N1, N2), f32)
    w2 = w2.at[0:hid_h, 0:h_dim].set(params["wh2"])
    w2 = w2.at[o1:o2, h_dim:2 * h_dim].set(params["wg2b"])
    w2 = w2.at[o2:o2 + hid_g, 2 * h_dim:2 * h_dim + hid_g].set(params["wg1b"])

    b2 = jnp.zeros((1, N2), f32)
    b2 = b2.at[:, 0:h_dim].set(params["bh2"])
    b2 = b2.at[:, h_dim:2 * h_dim].set(params["bg2b"])
    b2 = b2.at[:, 2 * h_dim:2 * h_dim + hid_g].set(params["bg1b"])

    weights = (
        w1x.astype(bf16), w1k.astype(bf16), b1,
        w2.astype(bf16), b2,
        params["wf1"].astype(bf16), params["bf1"],
        params["wf2"].astype(bf16), params["bf2"],
    )
    return weights, hid_g, params["wf1"].shape[1], N1, N2


def simple_sane_forward(x, k, params, *, tb=128):
    """Runs SimpleSANE forward. Returns (yhat, r, c) matching torch semantics."""
    B, x_dim = x.shape
    k_dim = k.shape[1]
    h_dim = params["wh2"].shape[1]
    y_dim = params["wf2"].shape[1]

    weights, hid_g, hid_f, N1, N2 = _prepare_fused(params, x_dim, k_dim, h_dim)

    # Batch tiling (multiple of 8 sublanes); pad batch to a multiple of TB.
    TB = min(tb, _round_up(B, 8))
    Bp = _round_up(B, TB)
    if Bp != B:
        x = jnp.pad(x, ((0, Bp - B), (0, 0)))
        k = jnp.pad(k, ((0, Bp - B), (0, 0)))

    OUT_PAD = _round_up(y_dim + hid_g + 1, 128)

    kernel = functools.partial(
        _sane_kernel, h_dim=h_dim, hid_g=hid_g, y_dim=y_dim, out_pad=OUT_PAD)

    resident = lambda w: pl.BlockSpec(w.shape, lambda i: (0, 0))
    in_specs = [
        pl.BlockSpec((TB, x_dim), lambda i: (i, 0)),
        pl.BlockSpec((TB, k_dim), lambda i: (i, 0)),
    ] + [resident(w) for w in weights]
    out_specs = pl.BlockSpec((TB, OUT_PAD), lambda i: (i, 0))

    flops = 2 * Bp * (x_dim * N1 + k_dim * N1 + N1 * N2
                      + h_dim * hid_f + hid_f * y_dim)
    transcendentals = Bp * (hid_g + 1)
    bytes_accessed = (
        (x.size + k.size) * 4
        + sum(int(w.size) * w.dtype.itemsize for w in weights)
        + Bp * OUT_PAD * 4)

    out = pl.pallas_call(
        kernel,
        out_shape=jax.ShapeDtypeStruct((Bp, OUT_PAD), jnp.float32),
        grid=(Bp // TB,),
        in_specs=in_specs,
        out_specs=out_specs,
        compiler_params=pltpu.CompilerParams(
            dimension_semantics=("parallel",),
        ),
        cost_estimate=pl.CostEstimate(
            flops=flops,
            transcendentals=transcendentals,
            bytes_accessed=bytes_accessed,
        ),
    )(x, k, *weights)

    yhat = out[:B, 0:y_dim]
    r = out[:B, y_dim:y_dim + hid_g]
    c = out[:B, y_dim + hid_g]
    return yhat, r, c


def init_params(key, x_dim, k_dim, y_dim, h_dim):
    """Deterministic synthetic weights with the exact shapes the module implies."""
    hid_f = min(h_dim, y_dim)           # f hidden_channels
    hid_g = min(x_dim, k_dim, h_dim)    # g hidden_channels (must equal h_dim)
    hid_h = min(x_dim, h_dim)           # h hidden_channels

    shapes = {
        # h: Linear(x_dim, hid_h), Linear(hid_h, h_dim)
        "wh1": (x_dim, hid_h), "bh1": (1, hid_h),
        "wh2": (hid_h, h_dim), "bh2": (1, h_dim),
        # g.g2: Linear(x_dim, hid_g), Linear(hid_g, h_dim)
        "wg2a": (x_dim, hid_g), "bg2a": (1, hid_g),
        "wg2b": (hid_g, h_dim), "bg2b": (1, h_dim),
        # g.g1: Linear(x_dim+k_dim, hid_g), Linear(hid_g, hid_g)
        "wg1a": (x_dim + k_dim, hid_g), "bg1a": (1, hid_g),
        "wg1b": (hid_g, hid_g), "bg1b": (1, hid_g),
        # f: Linear(h_dim, hid_f), Linear(hid_f, y_dim)
        "wf1": (h_dim, hid_f), "bf1": (1, hid_f),
        "wf2": (hid_f, y_dim), "bf2": (1, y_dim),
    }
    params = {}
    keys = jax.random.split(key, len(shapes))
    for (name, shape), kk in zip(shapes.items(), keys):
        params[name] = (0.1 * jax.random.normal(kk, shape)).astype(jnp.float32)
    return params


if __name__ == "__main__":
    # hid_g = min(x,k,h) must equal h_dim for r * k_tilde to be shape-valid,
    # so choose x_dim = k_dim = h_dim. Batch 256 with TB=128 exercises tiling.
    B, x_dim, k_dim, y_dim, h_dim = 256, 32, 32, 16, 32

    root = jax.random.PRNGKey(0)
    kx, kk_, kp = jax.random.split(root, 3)
    x = jax.random.normal(kx, (B, x_dim), dtype=jnp.float32)
    k = jax.random.normal(kk_, (B, k_dim), dtype=jnp.float32)
    params = init_params(kp, x_dim, k_dim, y_dim, h_dim)

    yhat, r, c = simple_sane_forward(x, k, params, tb=128)
    jax.block_until_ready((yhat, r, c))

    hid_g = min(x_dim, k_dim, h_dim)
    assert yhat.shape == (B, y_dim)
    assert r.shape == (B, hid_g)
    assert c.shape == (B,)
    assert bool(jnp.all(jnp.isfinite(yhat)))
    assert bool(jnp.all(jnp.isfinite(r)))
    assert bool(jnp.all(jnp.isfinite(c)))
    print("KERNEL_OK")
</pallas_src>

<mosaic_0001>
module attributes {stable_mosaic.version = 11 : i64} {
  func.func @_sane_kernel(%arg0: i32, %arg1: memref<128x32xf32, #tpu.memory_space<vmem>>, %arg2: memref<128x32xf32, #tpu.memory_space<vmem>>, %arg3: memref<32x128xbf16, #tpu.memory_space<vmem>>, %arg4: memref<32x128xbf16, #tpu.memory_space<vmem>>, %arg5: memref<1x128xf32, #tpu.memory_space<vmem>>, %arg6: memref<128x128xbf16, #tpu.memory_space<vmem>>, %arg7: memref<1x128xf32, #tpu.memory_space<vmem>>, %arg8: memref<32x16xbf16, #tpu.memory_space<vmem>>, %arg9: memref<1x16xf32, #tpu.memory_space<vmem>>, %arg10: memref<16x16xbf16, #tpu.memory_space<vmem>>, %arg11: memref<1x16xf32, #tpu.memory_space<vmem>>, %arg12: memref<128x128xf32, #tpu.memory_space<vmem>>) attributes {dimension_semantics = [#tpu.dimension_semantics<parallel>], iteration_bounds = array<i64: 2>, scalar_prefetch = 0 : i64, scratch_operands = 0 : i64, tpu.core_type = #tpu.core_type<tc>, window_params = [{transform_indices = @transform_0, window_bounds = array<i64: 128, 32>}, {transform_indices = @transform_1, window_bounds = array<i64: 128, 32>}, {pipeline_mode = #tpu.pipeline_mode<synchronous>, transform_indices = @transform_2, window_bounds = array<i64: 32, 128>}, {pipeline_mode = #tpu.pipeline_mode<synchronous>, transform_indices = @transform_3, window_bounds = array<i64: 32, 128>}, {pipeline_mode = #tpu.pipeline_mode<synchronous>, transform_indices = @transform_4, window_bounds = array<i64: 1, 128>}, {pipeline_mode = #tpu.pipeline_mode<synchronous>, transform_indices = @transform_5, window_bounds = array<i64: 128, 128>}, {pipeline_mode = #tpu.pipeline_mode<synchronous>, transform_indices = @transform_6, window_bounds = array<i64: 1, 128>}, {pipeline_mode = #tpu.pipeline_mode<synchronous>, transform_indices = @transform_7, window_bounds = array<i64: 32, 16>}, {pipeline_mode = #tpu.pipeline_mode<synchronous>, transform_indices = @transform_8, window_bounds = array<i64: 1, 16>}, {pipeline_mode = #tpu.pipeline_mode<synchronous>, transform_indices = @transform_9, window_bounds = array<i64: 16, 16>}, {pipeline_mode = #tpu.pipeline_mode<synchronous>, transform_indices = @transform_10, window_bounds = array<i64: 1, 16>}, {transform_indices = @transform_11, window_bounds = array<i64: 128, 128>}]} {
    %c0 = arith.constant 0 : index
    %c0_0 = arith.constant 0 : index
    %0 = vector.load %arg1[%c0, %c0_0] : memref<128x32xf32, #tpu.memory_space<vmem>>, vector<128x32xf32>
    %1 = arith.truncf %0 : vector<128x32xf32> to vector<128x32xbf16>
    %c0_1 = arith.constant 0 : index
    %c0_2 = arith.constant 0 : index
    %2 = vector.load %arg2[%c0_1, %c0_2] : memref<128x32xf32, #tpu.memory_space<vmem>>, vector<128x32xf32>
    %3 = arith.truncf %2 : vector<128x32xf32> to vector<128x32xbf16>
    %c0_3 = arith.constant 0 : index
    %c0_4 = arith.constant 0 : index
    %4 = vector.load %arg3[%c0_3, %c0_4] : memref<32x128xbf16, #tpu.memory_space<vmem>>, vector<32x128xbf16>
    %cst = arith.constant dense<0.000000e+00> : vector<128x128xf32>
    %5 = tpu.matmul %1, %4, %cst {dimension_numbers = #tpu.dot_dimension_numbers<[1], [0], [0], [1], [0, 0, 1, 1], [], []>} : vector<128x32xbf16>, vector<32x128xbf16>, vector<128x128xf32> -> vector<128x128xf32>
    %c0_5 = arith.constant 0 : index
    %c0_6 = arith.constant 0 : index
    %6 = vector.load %arg4[%c0_5, %c0_6] : memref<32x128xbf16, #tpu.memory_space<vmem>>, vector<32x128xbf16>
    %cst_7 = arith.constant dense<0.000000e+00> : vector<128x128xf32>
    %7 = tpu.matmul %3, %6, %cst_7 {dimension_numbers = #tpu.dot_dimension_numbers<[1], [0], [0], [1], [0, 0, 1, 1], [], []>} : vector<128x32xbf16>, vector<32x128xbf16>, vector<128x128xf32> -> vector<128x128xf32>
    %8 = arith.addf %5, %7 : vector<128x128xf32>
    %c0_8 = arith.constant 0 : index
    %c0_9 = arith.constant 0 : index
    %9 = vector.load %arg5[%c0_8, %c0_9] : memref<1x128xf32, #tpu.memory_space<vmem>>, vector<1x128xf32>
    %10 = vector.broadcast %9 : vector<1x128xf32> to vector<128x128xf32>
    %11 = arith.addf %8, %10 : vector<128x128xf32>
    %cst_10 = arith.constant 0.000000e+00 : f32
    %12 = vector.broadcast %cst_10 : f32 to vector<128x128xf32>
    %13 = arith.maximumf %11, %12 : vector<128x128xf32>
    %14 = arith.truncf %13 : vector<128x128xf32> to vector<128x128xbf16>
    %c0_11 = arith.constant 0 : index
    %c0_12 = arith.constant 0 : index
    %15 = vector.load %arg6[%c0_11, %c0_12] : memref<128x128xbf16, #tpu.memory_space<vmem>>, vector<128x128xbf16>
    %cst_13 = arith.constant dense<0.000000e+00> : vector<128x128xf32>
    %16 = tpu.matmul %14, %15, %cst_13 {dimension_numbers = #tpu.dot_dimension_numbers<[1], [0], [0], [1], [0, 0, 1, 1], [], []>} : vector<128x128xbf16>, vector<128x128xbf16>, vector<128x128xf32> -> vector<128x128xf32>
    %c0_14 = arith.constant 0 : index
    %c0_15 = arith.constant 0 : index
    %17 = vector.load %arg7[%c0_14, %c0_15] : memref<1x128xf32, #tpu.memory_space<vmem>>, vector<1x128xf32>
    %18 = vector.broadcast %17 : vector<1x128xf32> to vector<128x128xf32>
    %19 = arith.addf %16, %18 : vector<128x128xf32>
    %20 = vector.extract_strided_slice %19 {offsets = [0, 0], sizes = [128, 32], strides = [1, 1]} : vector<128x128xf32> to vector<128x32xf32>
    %21 = vector.extract_strided_slice %19 {offsets = [0, 32], sizes = [128, 32], strides = [1, 1]} : vector<128x128xf32> to vector<128x32xf32>
    %22 = vector.extract_strided_slice %19 {offsets = [0, 64], sizes = [128, 32], strides = [1, 1]} : vector<128x128xf32> to vector<128x32xf32>
    %23 = arith.negf %22 : vector<128x32xf32>
    %24 = math.exp %23 : vector<128x32xf32>
    %cst_16 = arith.constant 1.000000e+00 : f32
    %25 = vector.broadcast %cst_16 : f32 to vector<128x32xf32>
    %26 = arith.addf %25, %24 : vector<128x32xf32>
    %27 = arith.divf %25, %26 : vector<128x32xf32>
    %28 = arith.mulf %27, %21 : vector<128x32xf32>
    %29 = arith.addf %20, %28 : vector<128x32xf32>
    %30 = arith.truncf %29 : vector<128x32xf32> to vector<128x32xbf16>
    %c0_17 = arith.constant 0 : index
    %c0_18 = arith.constant 0 : index
    %31 = vector.load %arg8[%c0_17, %c0_18] : memref<32x16xbf16, #tpu.memory_space<vmem>>, vector<32x16xbf16>
    %cst_19 = arith.constant dense<0.000000e+00> : vector<128x16xf32>
    %32 = tpu.matmul %30, %31, %cst_19 {dimension_numbers = #tpu.dot_dimension_numbers<[1], [0], [0], [1], [0, 0, 1, 1], [], []>} : vector<128x32xbf16>, vector<32x16xbf16>, vector<128x16xf32> -> vector<128x16xf32>
    %c0_20 = arith.constant 0 : index
    %c0_21 = arith.constant 0 : index
    %33 = vector.load %arg9[%c0_20, %c0_21] : memref<1x16xf32, #tpu.memory_space<vmem>>, vector<1x16xf32>
    %34 = vector.broadcast %33 : vector<1x16xf32> to vector<128x16xf32>
    %35 = arith.addf %32, %34 : vector<128x16xf32>
    %cst_22 = arith.constant 0.000000e+00 : f32
    %36 = vector.broadcast %cst_22 : f32 to vector<128x16xf32>
    %37 = arith.maximumf %35, %36 : vector<128x16xf32>
    %38 = arith.truncf %37 : vector<128x16xf32> to vector<128x16xbf16>
    %c0_23 = arith.constant 0 : index
    %c0_24 = arith.constant 0 : index
    %39 = vector.load %arg10[%c0_23, %c0_24] : memref<16x16xbf16, #tpu.memory_space<vmem>>, vector<16x16xbf16>
    %cst_25 = arith.constant dense<0.000000e+00> : vector<128x16xf32>
    %40 = tpu.matmul %38, %39, %cst_25 {dimension_numbers = #tpu.dot_dimension_numbers<[1], [0], [0], [1], [0, 0, 1, 1], [], []>} : vector<128x16xbf16>, vector<16x16xbf16>, vector<128x16xf32> -> vector<128x16xf32>
    %c0_26 = arith.constant 0 : index
    %c0_27 = arith.constant 0 : index
    %41 = vector.load %arg11[%c0_26, %c0_27] : memref<1x16xf32, #tpu.memory_space<vmem>>, vector<1x16xf32>
    %42 = vector.broadcast %41 : vector<1x16xf32> to vector<128x16xf32>
    %43 = arith.addf %40, %42 : vector<128x16xf32>
    %44 = arith.mulf %28, %28 : vector<128x32xf32>
    %cst_28 = arith.constant dense<0.000000e+00> : vector<128xf32>
    %45 = vector.multi_reduction <add>, %44, %cst_28 [1] : vector<128x32xf32> to vector<128xf32>
    %46 = vector.shape_cast %45 : vector<128xf32> to vector<128x1xf32>
    %47 = arith.mulf %20, %20 : vector<128x32xf32>
    %cst_29 = arith.constant dense<0.000000e+00> : vector<128xf32>
    %48 = vector.multi_reduction <add>, %47, %cst_29 [1] : vector<128x32xf32> to vector<128xf32>
    %49 = vector.shape_cast %48 : vector<128xf32> to vector<128x1xf32>
    %50 = arith.addf %46, %49 : vector<128x1xf32>
    %51 = tpu.reciprocal %50 {approx = true} : vector<128x1xf32> -> vector<128x1xf32>
    %52 = arith.mulf %46, %51 : vector<128x1xf32>
    %53 = vector.shape_cast %52 : vector<128x1xf32> to vector<128x1xf32>
    %54 = vector.broadcast %53 : vector<128x1xf32> to vector<128x80xf32>
    %55 = tpu.concatenate %43, %27, %54 in 1 : vector<128x16xf32>, vector<128x32xf32>, vector<128x80xf32> -> vector<128x128xf32>
    %c0_30 = arith.constant 0 : index
    %c0_31 = arith.constant 0 : index
    %56 = vector.load %arg12[%c0_30, %c0_31] : memref<128x128xf32, #tpu.memory_space<vmem>>, vector<128x128xf32>
    tpu.vector_store %arg12[%c0_30, %c0_31], %55 {strides = array<i32>} : memref<128x128xf32, #tpu.memory_space<vmem>>, vector<128x128xf32>,
    return
  }
  func.func @transform_0(%arg0: i32) -> (i32, i32) {
    %c0_i32 = arith.constant 0 : i32
    %c0_i32_0 = arith.constant 0 : i32
    return %arg0, %c0_i32 : i32, i32
  }
  func.func @transform_1(%arg0: i32) -> (i32, i32) {
    %c0_i32 = arith.constant 0 : i32
    %c0_i32_0 = arith.constant 0 : i32
    return %arg0, %c0_i32 : i32, i32
  }
  func.func @transform_2(%arg0: i32) -> (i32, i32) {
    %c0_i32 = arith.constant 0 : i32
    %c0_i32_0 = arith.constant 0 : i32
    %c0_i32_1 = arith.constant 0 : i32
    return %c0_i32, %c0_i32_0 : i32, i32
  }
  func.func @transform_3(%arg0: i32) -> (i32, i32) {
    %c0_i32 = arith.constant 0 : i32
    %c0_i32_0 = arith.constant 0 : i32
    %c0_i32_1 = arith.constant 0 : i32
    return %c0_i32, %c0_i32_0 : i32, i32
  }
  func.func @transform_4(%arg0: i32) -> (i32, i32) {
    %c0_i32 = arith.constant 0 : i32
    %c0_i32_0 = arith.constant 0 : i32
    %c0_i32_1 = arith.constant 0 : i32
    return %c0_i32, %c0_i32_0 : i32, i32
  }
  func.func @transform_5(%arg0: i32) -> (i32, i32) {
    %c0_i32 = arith.constant 0 : i32
    %c0_i32_0 = arith.constant 0 : i32
    %c0_i32_1 = arith.constant 0 : i32
    return %c0_i32, %c0_i32_0 : i32, i32
  }
  func.func @transform_6(%arg0: i32) -> (i32, i32) {
    %c0_i32 = arith.constant 0 : i32
    %c0_i32_0 = arith.constant 0 : i32
    %c0_i32_1 = arith.constant 0 : i32
    return %c0_i32, %c0_i32_0 : i32, i32
  }
  func.func @transform_7(%arg0: i32) -> (i32, i32) {
    %c0_i32 = arith.constant 0 : i32
    %c0_i32_0 = arith.constant 0 : i32
    %c0_i32_1 = arith.constant 0 : i32
    return %c0_i32, %c0_i32_0 : i32, i32
  }
  func.func @transform_8(%arg0: i32) -> (i32, i32) {
    %c0_i32 = arith.constant 0 : i32
    %c0_i32_0 = arith.constant 0 : i32
    %c0_i32_1 = arith.constant 0 : i32
    return %c0_i32, %c0_i32_0 : i32, i32
  }
  func.func @transform_9(%arg0: i32) -> (i32, i32) {
    %c0_i32 = arith.constant 0 : i32
    %c0_i32_0 = arith.constant 0 : i32
    %c0_i32_1 = arith.constant 0 : i32
    return %c0_i32, %c0_i32_0 : i32, i32
  }
  func.func @transform_10(%arg0: i32) -> (i32, i32) {
    %c0_i32 = arith.constant 0 : i32
    %c0_i32_0 = arith.constant 0 : i32
    %c0_i32_1 = arith.constant 0 : i32
    return %c0_i32, %c0_i32_0 : i32, i32
  }
  func.func @transform_11(%arg0: i32) -> (i32, i32) {
    %c0_i32 = arith.constant 0 : i32
    %c0_i32_0 = arith.constant 0 : i32
    return %arg0, %c0_i32 : i32, i32
  }
}

</mosaic_0001>

<bundles_post_ra>
// kernel: tpu_custom_call.1
= control target key start
LH: loop header
LB: loop body
LE: loop exit
PB: predicated region body
PF: predicated region fallthrough
CT: control target
= control target key end

     0   :  { %s3341_s0 = inlined_call_operand.vmem [shape: f32[256,32], index: 0, kind: input, shape index: {}]   ;;  %s3342_s1 = inlined_call_operand.vmem [shape: f32[256,32], index: 1, kind: input, shape index: {}]   ;;  %s3343_s2 = inlined_call_operand.vmem [shape: bf16[32,128], index: 2, kind: input, shape index: {}]   ;;  %s3344_s3 = inlined_call_operand.vmem [shape: bf16[32,128], index: 3, kind: input, shape index: {}]   ;;  %s3345_s4 = inlined_call_operand.vmem [shape: f32[1,128], index: 4, kind: input, shape index: {}]   ;;  %s3346_s5 = inlined_call_operand.vmem [shape: bf16[128,128], index: 5, kind: input, shape index: {}]   ;;  %s3347_s6 = inlined_call_operand.vmem [shape: f32[1,128], index: 6, kind: input, shape index: {}]   ;;  %s3348_s7 = inlined_call_operand.vmem [shape: bf16[32,16], index: 7, kind: input, shape index: {}]   ;;  %s3349_s8 = inlined_call_operand.vmem [shape: f32[1,16], index: 8, kind: input, shape index: {}]   ;;  %s3350_s9 = inlined_call_operand.vmem [shape: bf16[16,16], index: 9, kind: input, shape index: {}]   ;;  %s3351_s10 = inlined_call_operand.vmem [shape: f32[1,16], index: 10, kind: input, shape index: {}]   ;;  %s3352_s11 = inlined_call_operand.hbm [shape: f32[256,128], index: 11, kind: output, shape index: {}]  }
   0x1   :  { %3353 = sst [smem:[#allocation5_spill]] %s3341_s0 }
   0x2   :  { %16 = vsyncpa [#allocation3], 0 }
   0x3   :  { %18 = vsyncpa [#allocation3 + $0x1], 0  ;;  %s2334_s17 = smov 0   ;;  %s2336_s18 = smov 0  }
   0x4   :  { %s2338_s19 = smov 0   ;;  %s2340_s20 = smov 0  }
   0x5 LB: > { %s2355_s21 = sadd.s32 4294967295, %s2267_s20   ;;  %s1917_s22 = sadd.s32 4294967294, %s2267_s20   ;;  %s2267_s20 = sphi %s2340_s20, %s3374_s20   ;;  %s2263_s19 = sphi %s2338_s19, %s3373_s19   ;;  %s2259_s18 = sphi %s2336_s18, %s3372_s18   ;;  %s2255_s17 = sphi %s2334_s17, %s3371_s17  }
   0x6   : > { %s2359_s23 = sadd.s32 1, %s2267_s20   ;;  %s272_s24 = sadd.s32 1, %s2263_s19 }
   0x7   : > { %s269_s25 = ssub.s32 %s2267_s20, %s2359_s23  ;;  %p282_p0 = scmp.ne.s32.totalorder %s2263_s19, %s2259_s18 }
   0x8   : > { %p270_p1 = scmp.eq.s32.totalorder %s269_s25, 0  ;;  %p283_p2 = scmp.eq.s32.totalorder %s2355_s21, 1 }
   0x9   : > { %p288_p3 = scmp.ne.s32.totalorder %s2259_s18, %s2255_s17  ;;  %p289_p4 = scmp.eq.s32.totalorder %s1917_s22, 1 }
   0xa   : > { %s2370_s26 = scalar_select %p270_p1, %s2263_s19, %s272_s24  }
   0xb   : > { %p2372_p5 = por %p283_p2, %p282_p0  ;;  %p2376_p6 = por %p289_p4, %p288_p3 }
   0xc   : > { %p1920_p7 = scmp.ge.s32.totalorder %s2267_s20, 1  ;;  %p352_p8 = scmp.lt.s32.totalorder %s2267_s20, 3 }
   0xe   : > { %p353_p9 = pnand %p1920_p7, %p352_p8 }
   0xf   : > { %s1922_s12 = sshll.u32 (!%p353_p9), %s2355_s21, 4  ;;  %s3356_s0 = sld [smem:[#allocation5_spill]] (!%p353_p9) }
  0x10   : > { %356 = sbr.rel (%p353_p9) target bundleno = 1120 (0x460), region = 64  ;;  %p398_p10 = scmp.lt.s32.totalorder (!%p353_p9), %s1922_s12, 31 }
  0x11   : > { %s2269_s24 = smov (!%p353_p9), 32   ;;  %s2270_s25 = smov (!%p353_p9), 64  }
  0x12   : > { %s2054_s16 = sshll.u32 (!%p353_p9), %s2355_s21, 7 }
  0x15   : > { %v2042_v0 = vld [vmem:[%s3344_s3 + $0x8] sm:$0xff]  ;;  %v2041_v1 = vld [vmem:[%s3344_s3] sm:$0xff]  ;;  %s3376_s12 = smov (!%p398_p10, %s1922_s12), 31  ;;  %vm479_vm0 = vcmask 261120   ;;  %v2050_v40 = vld [vmem:[%s3346_s5 + $0x38] sm:$0xff] }
  0x16   : > { %2055 = vmatpush.bf16.msra.mxu1 %v2042_v0  ;;  %510 = vmatpush.bf16.msra.mxu0 %v2042_v0  ;;  %v2040_v2 = vld [vmem:[%s3343_s2 + $0x8] sm:$0xff]  ;;  %s1923_s22 = sshll.u32 %s3376_s12, 3  ;;  %v2039_v5 = vld [vmem:[%s3343_s2] sm:$0xff]  ;;  %v2049_v41 = vld [vmem:[%s3346_s5 + $0x30] sm:$0xff]  ;;  %s394_s12 = sand.u32 1, %s2259_s18  }
  0x17   : > { %2056 = vmatpush.bf16.msra.mxu2 %v2042_v0  ;;  %2057 = vmatpush.bf16.msra.mxu3 %v2042_v0  ;;  %s2398_s29 = scalar_lea.vmem %s3342_s1, %s1923_s22  ;;  %s2418_s15 = scalar_lea.vmem %s3356_s0, %s1923_s22  ;;  %v2048_v42 = vld [vmem:[%s3346_s5 + $0x28] sm:$0xff]  ;;  %v2047_v43 = vld [vmem:[%s3346_s5 + $0x20] sm:$0xff]  ;;  %v2046_v45 = vld [vmem:[%s3346_s5 + $0x18] sm:$0xff] }
  0x18   : > { %v439_v3 = vld [vmem:[%s2398_s29 + $0x20] sm:$0xff]  ;;  %v440_v4 = vld [vmem:[%s2398_s29 + $0x28] sm:$0xff]  ;;  %v441_v10 = vld [vmem:[%s2398_s29 + $0x30] sm:$0xff]  ;;  %s1921_s13 = sshll.u32 %s394_s12, 7  ;;  %s1828_s21 = scalar_lea.sflag [#allocation3], %s394_s12 }
  0x19   : > { %v453_v6 = vpack.c.bf16 %v440_v4, %v439_v3  ;;  %v435_v7 = vld [vmem:[%s2398_s29] sm:$0xff]  ;;  %v436_v8 = vld [vmem:[%s2398_s29 + $0x8] sm:$0xff]  ;;  %v442_v11 = vld [vmem:[%s2398_s29 + $0x38] sm:$0xff]  ;;  %s3223_s14 = scalar_lea.vmem [#allocation2], %s1921_s13 }
  0x1a   : > { %2058 = vmatpush.bf16.msra.mxu1 %v2041_v1  ;;  %511 = vmatpush.bf16.msra.mxu0 %v2041_v1  ;;  %v451_v9 = vpack.c.bf16 %v436_v8, %v435_v7  ;;  %v437_v12 = vld [vmem:[%s2398_s29 + $0x10] sm:$0xff]  ;;  %v438_v13 = vld [vmem:[%s2398_s29 + $0x18] sm:$0xff]  ;;  %v454_v14 = vpack.c.bf16 %v442_v11, %v441_v10  ;;  %v411_v16 = vld [vmem:[%s2418_s15] sm:$0xff] }
  0x1b   : > { %2059 = vmatpush.bf16.msra.mxu2 %v2041_v1  ;;  %2060 = vmatpush.bf16.msra.mxu3 %v2041_v1  ;;  %v452_v15 = vpack.c.bf16 %v438_v13, %v437_v12  ;;  %v412_v17 = vld [vmem:[%s2418_s15 + $0x8] sm:$0xff]  ;;  %v413_v19 = vld [vmem:[%s2418_s15 + $0x10] sm:$0xff]  ;;  %v414_v20 = vld [vmem:[%s2418_s15 + $0x18] sm:$0xff] }
  0x1c   : > { %v427_v18 = vpack.c.bf16 %v412_v17, %v411_v16  ;;  %v428_v21 = vpack.c.bf16 %v414_v20, %v413_v19  ;;  %v443_v22 = vld [vmem:[%s2398_s29 + $0x40] sm:$0xff]  ;;  %v444_v23 = vld [vmem:[%s2398_s29 + $0x48] sm:$0xff]  ;;  %v417_v28 = vld [vmem:[%s2418_s15 + $0x30] sm:$0xff] }
  0x1d   : > { %1936 = vmatmul.msk.bf16.vlgmr.msra.gmra.mxu1 %vm479_vm0, %v453_v6  ;;  %1934 = vmatmul.msk.bf16.vlgmr.msra.gmra.mxu0 %vm479_vm0, %v451_v9  ;;  %v455_v24 = vpack.c.bf16 %v444_v23, %v443_v22  ;;  %v415_v25 = vld [vmem:[%s2418_s15 + $0x20] sm:$0xff]  ;;  %v416_v26 = vld [vmem:[%s2418_s15 + $0x28] sm:$0xff]  ;;  %v418_v29 = vld [vmem:[%s2418_s15 + $0x38] sm:$0xff] }
  0x1e   : > { %595 = vmatpush.bf16.msrb.mxu1 %v2040_v2  ;;  %v429_v27 = vpack.c.bf16 %v416_v26, %v415_v25  ;;  %v430_v30 = vpack.c.bf16 %v418_v29, %v417_v28  ;;  %v419_v31 = vld [vmem:[%s2418_s15 + $0x40] sm:$0xff]  ;;  %v420_v32 = vld [vmem:[%s2418_s15 + $0x48] sm:$0xff]  ;;  %v445_v34 = vld [vmem:[%s2398_s29 + $0x50] sm:$0xff] }
  0x1f   : > { %1938 = vmatmul.msk.bf16.vlgmr.msra.gmra.mxu2 %vm479_vm0, %v455_v24  ;;  %v431_v33 = vpack.c.bf16 %v420_v32, %v419_v31  ;;  %v446_v35 = vld [vmem:[%s2398_s29 + $0x58] sm:$0xff]  ;;  %v421_v37 = vld [vmem:[%s2418_s15 + $0x50] sm:$0xff]  ;;  %v2044_v48 = vld [vmem:[%s3346_s5 + $0x8] sm:$0xff] }
  0x20   : > { %v456_v36 = vpack.c.bf16 %v446_v35, %v445_v34  ;;  %v422_v38 = vld [vmem:[%s2418_s15 + $0x58] sm:$0xff]  ;;  %750 = vmatpush.bf16.msrb.mxu2 %v2050_v40  ;;  %v2045_v46 = vld [vmem:[%s3346_s5 + $0x10] sm:$0xff]  ;;  %v2043_v49 = vld [vmem:[%s3346_s5] sm:$0xff] }
  0x21   : > { %v432_v39 = vpack.c.bf16 %v422_v38, %v421_v37  ;;  %v447_v50 = vld [vmem:[%s2398_s29 + $0x60] sm:$0xff]  ;;  %v448_v51 = vld [vmem:[%s2398_s29 + $0x68] sm:$0xff]  ;;  %v449_v59 = vld [vmem:[%s2398_s29 + $0x70] sm:$0xff] }
  0x22   : > { %596 = vmatpush.bf16.msrb.mxu1 %v2039_v5  ;;  %v457_v53 = vpack.c.bf16 %v448_v51, %v447_v50  ;;  %v423_v54 = vld [vmem:[%s2418_s15 + $0x60] sm:$0xff]  ;;  %v424_v55 = vld [vmem:[%s2418_s15 + $0x68] sm:$0xff]  ;;  %v450_v60 = vld [vmem:[%s2398_s29 + $0x78] sm:$0xff]  ;;  %s2225_s29 = scalar_lea.hbm %s3352_s11, 256 }
  0x23   : > { %v433_v56 = vpack.c.bf16 %v424_v55, %v423_v54  ;;  %v458_v62 = vpack.c.bf16 %v450_v60, %v449_v59  ;;  %v2480_v1 = vld [vmem:[%s3345_s4] ss:$0 sm:$0xff]  ;;  %v425_v2 = vld [vmem:[%s2418_s15 + $0x70] sm:$0xff]  ;;  %v426_v3 = vld [vmem:[%s2418_s15 + $0x78] sm:$0xff]  ;;  %s1839_s15 = scalar_lea.hbm %s3352_s11, %s2054_s16 }
  0x24   : > { %751 = vmatpush.bf16.msrb.mxu2 %v2049_v41  ;;  %1940 = vmatmul.msk.bf16.vlgmr.msra.gmra.mxu3 %vm479_vm0, %v457_v53  ;;  %v434_v4 = vpack.c.bf16 %v426_v3, %v425_v2 }
  0x28   : > { %752 = vmatpush.bf16.msrb.mxu2 %v2048_v42 }
  0x2c   : > { %753 = vmatpush.bf16.msrb.mxu2 %v2047_v43 }
  0x2d   : > { %1937 = vmatmul.msk.bf16.gmra.mxu1 %vm479_vm0, %v454_v14  ;;  %1935 = vmatmul.msk.bf16.gmra.mxu0 %vm479_vm0, %v452_v15 }
  0x2f   : > { %1939 = vmatmul.msk.bf16.gmra.mxu2 %vm479_vm0, %v456_v36 }
  0x30   : > { %754 = vmatpush.bf16.msrb.mxu2 %v2046_v45 }
  0x34   : > { %755 = vmatpush.bf16.msrb.mxu2 %v2045_v46  ;;  %1941 = vmatmul.msk.bf16.gmra.mxu3 %vm479_vm0, %v458_v62 }
  0x38   : > { %756 = vmatpush.bf16.msrb.mxu2 %v2044_v48 }
  0x3c   : > { %757 = vmatpush.bf16.msrb.mxu2 %v2043_v49 }
  0x3d   : > { %1950 = vmatmul.msk.bf16.vlgmr.msrb.gmra.mxu1 %vm479_vm0, %v427_v18 }
  0x4d   : > { %1951 = vmatmul.msk.bf16.gmra.mxu1 %vm479_vm0, %v428_v21 }
  0x5d   : > { %1952 = vmatmul.msk.bf16.gmra.mxu1 %vm479_vm0, %v429_v27 }
  0x6d   : > { %1953 = vmatmul.msk.bf16.gmra.mxu1 %vm479_vm0, %v430_v30 }
  0x7d   : > { %1954 = vmatmul.msk.bf16.gmra.mxu1 %vm479_vm0, %v431_v33 }
  0x8d   : > { %1955 = vmatmul.msk.bf16.gmra.mxu1 %vm479_vm0, %v432_v39 }
  0x9a   : > { %v523_v44 = vpop.f32.mrf.mxu1  ;;  %v513_v58 = vpop.f32.mrf.mxu0 }
  0x9d   : > { %1956 = vmatmul.msk.bf16.gmra.mxu1 %vm479_vm0, %v433_v56 }
  0xa2   : > { %v525_v47 = vpop.f32.mrf.mxu1  ;;  %v515_v63 = vpop.f32.mrf.mxu0 }
  0xa3   : > { %v533_v35 = vpop.f32.mrf.mxu2 }
  0xaa   : > { %v528_v52 = vpop.f32.mrf.mxu1  ;;  %v518_v9 = vpop.f32.mrf.mxu0 }
  0xab   : > { %v535_v43 = vpop.f32.mrf.mxu2 }
  0xad   : > { %1957 = vmatmul.msk.bf16.gmra.mxu1 %vm479_vm0, %v434_v4 }
  0xb2   : > { %v530_v57 = vpop.f32.mrf.mxu1  ;;  %v520_v15 = vpop.f32.mrf.mxu0 }
  0xb3   : > { %v538_v50 = vpop.f32.mrf.mxu2 }
  0xba   : > { %v598_v61 = vpop.f32.mrf.mxu1 }
  0xbb   : > { %v599_v0 = vadd.f32 %v598_v61, %v513_v58  ;;  %v540_v55 = vpop.f32.mrf.mxu2 }
  0xbd   : > { %v642_v6 = vadd.f32 %v2480_v1, %v599_v0 }
  0xbf   : > { %v658_v10 = vmax.f32 %v642_v6, 0.0 }
  0xc2   : > { %v600_v5 = vpop.f32.mrf.mxu1 }
  0xc3   : > { %v601_v7 = vadd.f32 %v600_v5, %v515_v63  ;;  %v543_v63 = vpop.f32.mrf.mxu3 }
  0xc5   : > { %v643_v8 = vadd.f32 %v2480_v1, %v601_v7 }
  0xc7   : > { %v659_v11 = vmax.f32 %v643_v8, 0.0 }
  0xc9   : > { %v674_v12 = vpack.c.bf16 %v659_v11, %v658_v10 }
  0xca   : > { %v603_v13 = vpop.f32.mrf.mxu1 }
  0xcb   : > { %758 = vmatmul.bf16.vlgmr.msrb.gmra.mxu2 %v674_v12  ;;  %v604_v14 = vadd.f32 %v603_v13, %v518_v9  ;;  %v545_v2 = vpop.f32.mrf.mxu3 }
  0xcd   : > { %v644_v16 = vadd.f32 %v2480_v1, %v604_v14 }
  0xcf   : > { %v660_v19 = vmax.f32 %v644_v16, 0.0 }
  0xd2   : > { %v605_v17 = vpop.f32.mrf.mxu1 }
  0xd3   : > { %v606_v18 = vadd.f32 %v605_v17, %v520_v15  ;;  %v548_v11 = vpop.f32.mrf.mxu3 }
  0xd5   : > { %v645_v20 = vadd.f32 %v2480_v1, %v606_v18 }
  0xd7   : > { %v661_v21 = vmax.f32 %v645_v20, 0.0 }
  0xd9   : > { %v675_v22 = vpack.c.bf16 %v661_v21, %v660_v19  ;;  %v2504_v19 = vld [vmem:[%s3347_s6] ss:$0 sm:$0xff] }
  0xda   : > { %v608_v23 = vpop.f32.mrf.mxu1 }
  0xdb   : > { %763 = vmatmul.bf16.gmra.mxu2 %v675_v22  ;;  %v609_v24 = vadd.f32 %v608_v23, %v523_v44  ;;  %v550_v13 = vpop.f32.mrf.mxu3 }
  0xdd   : > { %v646_v26 = vadd.f32 %v2480_v1, %v609_v24 }
  0xdf   : > { %v662_v29 = vmax.f32 %v646_v26, 0.0 }
  0xe2   : > { %v610_v25 = vpop.f32.mrf.mxu1 }
  0xe3   : > { %v611_v27 = vadd.f32 %v610_v25, %v525_v47 }
  0xe5   : > { %v647_v28 = vadd.f32 %v2480_v1, %v611_v27 }
  0xe7   : > { %v663_v30 = vmax.f32 %v647_v28, 0.0 }
  0xe9   : > { %v676_v31 = vpack.c.bf16 %v663_v30, %v662_v29 }
  0xea   : > { %v613_v32 = vpop.f32.mrf.mxu1 }
  0xeb   : > { %768 = vmatmul.bf16.gmra.mxu2 %v676_v31  ;;  %v614_v33 = vadd.f32 %v613_v32, %v528_v52 }
  0xed   : > { %v648_v36 = vadd.f32 %v2480_v1, %v614_v33 }
  0xef   : > { %v664_v39 = vmax.f32 %v648_v36, 0.0 }
  0xf2   : > { %v615_v34 = vpop.f32.mrf.mxu1 }
  0xf3   : > { %v616_v37 = vadd.f32 %v615_v34, %v530_v57 }
  0xf5   : > { %v649_v38 = vadd.f32 %v2480_v1, %v616_v37 }
  0xf7   : > { %v665_v40 = vmax.f32 %v649_v38, 0.0 }
  0xf9   : > { %v677_v41 = vpack.c.bf16 %v665_v40, %v664_v39 }
  0xfa   : > { %v618_v42 = vpop.f32.mrf.mxu1 }
  0xfb   : > { %773 = vmatmul.bf16.gmra.mxu2 %v677_v41  ;;  %v619_v44 = vadd.f32 %v618_v42, %v533_v35 }
  0xfd   : > { %v650_v45 = vadd.f32 %v2480_v1, %v619_v44 }
  0xff   : > { %v666_v48 = vmax.f32 %v650_v45, 0.0 }
 0x102   : > { %v620_v46 = vpop.f32.mrf.mxu1 }
 0x103   : > { %v621_v47 = vadd.f32 %v620_v46, %v535_v43 }
 0x105   : > { %v651_v49 = vadd.f32 %v2480_v1, %v621_v47 }
 0x107   : > { %v667_v51 = vmax.f32 %v651_v49, 0.0 }
 0x109   : > { %v678_v52 = vpack.c.bf16 %v667_v51, %v666_v48 }
 0x10a   : > { %v623_v53 = vpop.f32.mrf.mxu1 }
 0x10b   : > { %778 = vmatmul.bf16.gmra.mxu2 %v678_v52  ;;  %v624_v54 = vadd.f32 %v623_v53, %v538_v50 }
 0x10d   : > { %v652_v56 = vadd.f32 %v2480_v1, %v624_v54 }
 0x10f   : > { %v668_v59 = vmax.f32 %v652_v56, 0.0 }
 0x112   : > { %v625_v57 = vpop.f32.mrf.mxu1 }
 0x113   : > { %v626_v58 = vadd.f32 %v625_v57, %v540_v55 }
 0x115   : > { %v653_v60 = vadd.f32 %v2480_v1, %v626_v58 }
 0x117   : > { %v669_v61 = vmax.f32 %v653_v60, 0.0 }
 0x119   : > { %v679_v62 = vpack.c.bf16 %v669_v61, %v668_v59 }
 0x11a   : > { %v628_v0 = vpop.f32.mrf.mxu1 }
 0x11b   : > { %783 = vmatmul.bf16.gmra.mxu2 %v679_v62  ;;  %v629_v4 = vadd.f32 %v628_v0, %v543_v63 }
 0x11d   : > { %v654_v6 = vadd.f32 %v2480_v1, %v629_v4 }
 0x11f   : > { %v670_v8 = vmax.f32 %v654_v6, 0.0 }
 0x122   : > { %v630_v3 = vpop.f32.mrf.mxu1 }
 0x123   : > { %v631_v5 = vadd.f32 %v630_v3, %v545_v2 }
 0x125   : > { %v655_v7 = vadd.f32 %v2480_v1, %v631_v5 }
 0x127   : > { %v671_v9 = vmax.f32 %v655_v7, 0.0 }
 0x129   : > { %v680_v10 = vpack.c.bf16 %v671_v9, %v670_v8 }
 0x12a   : > { %v633_v12 = vpop.f32.mrf.mxu1 }
 0x12b   : > { %788 = vmatmul.bf16.gmra.mxu2 %v680_v10  ;;  %v634_v15 = vadd.f32 %v633_v12, %v548_v11 }
 0x12d   : > { %v656_v17 = vadd.f32 %v2480_v1, %v634_v15 }
 0x12f   : > { %v672_v20 = vmax.f32 %v656_v17, 0.0 }
 0x132   : > { %v635_v14 = vpop.f32.mrf.mxu1 }
 0x133   : > { %v636_v16 = vadd.f32 %v635_v14, %v550_v13 }
 0x135   : > { %v657_v18 = vadd.f32 %v2480_v1, %v636_v16 }
 0x137   : > { %v673_v21 = vmax.f32 %v657_v18, 0.0 }
 0x139   : > { %v681_v23 = vpack.c.bf16 %v673_v21, %v672_v20 }
 0x13b   : > { %793 = vmatmul.bf16.gmra.mxu2 %v681_v23 }
 0x14e   : > { %v759_v22 = vpop.f32.mrf.mxu2 }
 0x14f   : > { %v2507_v24 = vadd.f32 %v2504_v19, %v759_v22 }
 0x151   : > { %1119 = vrot.lane.b32.xlu0 %v2507_v24, %s2269_s24  ;;  %v1990_v36 = vmul.f32 -1.442695, %v2507_v24 }
 0x153   : > { %2109 = vpow2.f32 %v1990_v36 }
 0x156   : > { %v761_v25 = vpop.f32.mrf.mxu2 }
 0x157   : > { %v2512_v1 = vadd.f32 %v2504_v19, %v761_v25 }
 0x159   : > { %1121 = vrot.lane.b32.xlu0 %v2512_v1, %s2269_s24  ;;  %v1991_v37 = vmul.f32 -1.442695, %v2512_v1  ;;  %v2110_v38 = vpop.eup %2109 }
 0x15a   : > { %v847_v39 = vadd.f32 1.0, %v2110_v38 }
 0x15b   : > { %2111 = vpow2.f32 %v1991_v37 }
 0x15c   : > { %2113 = vrcp.f32 %v847_v39  ;;  %v874_v0 = vand.u32 2147483648, %v847_v39  ;;  %vm868_vm2 = vweird.f32 %v847_v39  ;;  %v872_v2 = vand.u32 2147483647, %v847_v39 }
 0x15e   : > { %v764_v26 = vpop.f32.mrf.mxu2  ;;  %v875_v9 = vor.u32 1.1754944e-38, %v874_v0  ;;  %vm873_vm4 = vcmp.eq.f32.partialorder %v872_v2, 8.507059e+37 }
 0x15f   : > { %v2517_v27 = vadd.f32 %v2504_v19, %v764_v26 }
 0x161   : > { %1123 = vrot.lane.b32.xlu1 %v2517_v27, %s2269_s24  ;;  %v1992_v40 = vmul.f32 -1.442695, %v2517_v27  ;;  %v2112_v41 = vpop.eup %2111 }
 0x162   : > { %v2544_v42 = vadd.f32 1.0, %v2112_v41  ;;  %v2114_v43 = vpop.eup %2113 }
 0x163   : > { %2115 = vpow2.f32 %v1992_v40  ;;  %v864_v48 = vmul.f32 %v2114_v43, %v847_v39  ;;  %vm869_vm1 = vweird.f32 %v2114_v43 }
 0x164   : > { %2117 = vrcp.f32 %v2544_v42  ;;  %vm870_vm3 = vmor %vm868_vm2, %vm869_vm1  ;;  %v889_v18 = vand.u32 2147483648, %v2544_v42  ;;  %vm883_vm6 = vweird.f32 %v2544_v42  ;;  %v887_v21 = vand.u32 2147483647, %v2544_v42 }
 0x165   : > { %v865_v50 = vsub.f32 1.0, %v864_v48 }
 0x166   : > { %v766_v28 = vpop.f32.mrf.mxu2  ;;  %v890_v26 = vor.u32 1.1754944e-38, %v889_v18  ;;  %vm888_vm8 = vcmp.eq.f32.partialorder %v887_v21, 8.507059e+37 }
 0x167   : > { %v2522_v29 = vadd.f32 %v2504_v19, %v766_v28  ;;  %v866_v56 = vmul.f32 %v2114_v43, %v865_v50 }
 0x169   : > { %1125 = vrot.lane.b32.xlu1 %v2522_v29, %s2269_s24  ;;  %v1993_v44 = vmul.f32 -1.442695, %v2522_v29  ;;  %v2116_v47 = vpop.eup %2115  ;;  %v867_v61 = vadd.f32 %v2114_v43, %v866_v56 }
 0x16a   : > { %v2551_v49 = vadd.f32 1.0, %v2116_v47  ;;  %v2118_v51 = vpop.eup %2117 }
 0x16b   : > { %2119 = vpow2.f32 %v1993_v44  ;;  %v879_v57 = vmul.f32 %v2118_v51, %v2544_v42  ;;  %v871_v5 = vsel %vm870_vm3, %v2114_v43, %v867_v61  ;;  %vm884_vm5 = vweird.f32 %v2118_v51 }
 0x16c   : > { %v2573_v12 = vsel %vm873_vm4, %v875_v9, %v871_v5  ;;  %vm885_vm7 = vmor %vm883_vm6, %vm884_vm5  ;;  %vm898_vm9 = vweird.f32 %v2551_v49  ;;  %v904_v37 = vand.u32 2147483648, %v2551_v49  ;;  %v902_v41 = vand.u32 2147483647, %v2551_v49 }
 0x16d   : > { %v880_v62 = vsub.f32 1.0, %v879_v57 }
 0x16e   : > { %v769_v30 = vpop.f32.mrf.mxu2  ;;  %v905_v48 = vor.u32 1.1754944e-38, %v904_v37  ;;  %vm903_vm12 = vcmp.eq.f32.partialorder %v902_v41, 8.507059e+37 }
 0x16f   : > { %v2527_v31 = vadd.f32 %v2504_v19, %v769_v30  ;;  %v881_v6 = vmul.f32 %v2118_v51, %v880_v62 }
 0x171   : > { %1127 = vrot.lane.b32.xlu2 %v2527_v31, %s2269_s24  ;;  %v1994_v52 = vmul.f32 -1.442695, %v2527_v31  ;;  %v2120_v55 = vpop.eup %2119  ;;  %v882_v15 = vadd.f32 %v2118_v51, %v881_v6 }
 0x172   : > { %v2559_v59 = vadd.f32 1.0, %v2120_v55 }
 0x173   : > { %v886_v22 = vsel %vm885_vm7, %v2118_v51, %v882_v15 }
 0x174   : > { %vm913_vm13 = vweird.f32 %v2559_v59  ;;  %v919_v57 = vand.u32 2147483648, %v2559_v59  ;;  %v917_v0 = vand.u32 2147483647, %v2559_v59 }
 0x176   : > { %v771_v32 = vpop.f32.mrf.mxu2  ;;  %v920_v6 = vor.u32 1.1754944e-38, %v919_v57  ;;  %vm918_vm4 = vcmp.eq.f32.partialorder %v917_v0, 8.507059e+37 }
 0x177   : > { %v2532_v33 = vadd.f32 %v2504_v19, %v771_v32 }
 0x179   : > { %1129 = vrot.lane.b32.xlu2 %v2532_v33, %s2269_s24  ;;  %v1995_v46 = vmul.f32 -1.442695, %v2532_v33 }
 0x17b   : > { %2121 = vpow2.f32 %v1995_v46 }
 0x17c   : > { %2123 = vrcp.f32 %v2551_v49 }
 0x17d   : > { %2125 = vpow2.f32 %v1994_v52 }
 0x17e   : > { %v774_v34 = vpop.f32.mrf.mxu2 }
 0x17f   : > { %v2537_v35 = vadd.f32 %v2504_v19, %v774_v34  ;;  %v2604_v34 = vsel %vm888_vm8, %v890_v26, %v886_v22 }
 0x181   : > { %1131 = vrot.lane.b32.xlu2 %v2537_v35, %s2269_s24  ;;  %v1996_v54 = vmul.f32 -1.442695, %v2537_v35  ;;  %v2122_v58 = vpop.eup %2121 }
 0x182   : > { %v2561_v60 = vadd.f32 1.0, %v2122_v58  ;;  %v2563_v63 = vpop.eup %2123 }
 0x183   : > { %2127 = vpow2.f32 %v1996_v54  ;;  %v2126_v3 = vpop.eup %2125  ;;  %v894_v7 = vmul.f32 %v2563_v63, %v2551_v49  ;;  %vm899_vm10 = vweird.f32 %v2563_v63 }
 0x184   : > { %2129 = vrcp.f32 %v2559_v59  ;;  %v2571_v10 = vadd.f32 1.0, %v2126_v3  ;;  %vm2614_vm11 = vmor %vm898_vm9, %vm899_vm10  ;;  %vm943_vm2 = vweird.f32 %v2561_v60 }
 0x185   : > { %2131 = vrcp.f32 %v2561_v60  ;;  %v895_v16 = vsub.f32 1.0, %v894_v7 }
 0x186   : > { %v2547_v45 = vpop.f32.mrf.mxu2  ;;  %2133 = vrcp.f32 %v2571_v10  ;;  %vm928_vm8 = vweird.f32 %v2571_v10 }
 0x187   : > { %v896_v23 = vmul.f32 %v2563_v63, %v895_v16  ;;  %v2602_v32 = vadd.f32 %v2504_v19, %v2547_v45 }
 0x189   : > { %v2128_v8 = vpop.eup %2127  ;;  %v897_v40 = vadd.f32 %v2563_v63, %v896_v23 }
 0x18a   : > { %v2575_v13 = vadd.f32 1.0, %v2128_v8  ;;  %v2580_v17 = vpop.eup %2129 }
 0x18b   : > { %v2583_v20 = vpop.eup %2131  ;;  %v909_v25 = vmul.f32 %v2580_v17, %v2559_v59  ;;  %v901_v49 = vsel %vm2614_vm11, %v2563_v63, %v897_v40  ;;  %vm914_vm14 = vweird.f32 %v2580_v17  ;;  %v947_v59 = vand.u32 2147483647, %v2561_v60 }
 0x18c   : > { %2135 = vrcp.f32 %v2575_v13  ;;  %v939_v28 = vmul.f32 %v2583_v20, %v2561_v60  ;;  %v2607_v38 = vpop.eup %2133  ;;  %v2637_v56 = vsel %vm903_vm12, %v905_v48, %v901_v49  ;;  %vm944_vm15 = vweird.f32 %v2583_v20  ;;  %vm2651_vm1 = vmor %vm913_vm13, %vm914_vm14 }
 0x18d   : > { %v910_v42 = vsub.f32 1.0, %v909_v25  ;;  %v924_v47 = vmul.f32 %v2607_v38, %v2571_v10  ;;  %vm945_vm3 = vmor %vm943_vm2, %vm944_vm15  ;;  %vm929_vm5 = vweird.f32 %v2607_v38  ;;  %vm948_vm6 = vcmp.eq.f32.partialorder %v947_v59, 8.507059e+37 }
 0x18e   : > { %v2554_v53 = vpop.f32.mrf.mxu2  ;;  %v940_v43 = vsub.f32 1.0, %v939_v28  ;;  %v934_v25 = vand.u32 2147483648, %v2571_v10  ;;  %vm930_vm9 = vmor %vm928_vm8, %vm929_vm5  ;;  %vm958_vm10 = vweird.f32 %v2575_v13  ;;  %v962_v37 = vand.u32 2147483647, %v2575_v13 }
 0x18f   : > { %v911_v50 = vmul.f32 %v2580_v17, %v910_v42  ;;  %v925_v54 = vsub.f32 1.0, %v924_v47  ;;  %v2642_v58 = vadd.f32 %v2504_v19, %v2554_v53  ;;  %v949_v53 = vand.u32 2147483648, %v2561_v60 }
 0x190   : > { %v941_v51 = vmul.f32 %v2583_v20, %v940_v43  ;;  %v935_v40 = vor.u32 1.1754944e-38, %v934_v25  ;;  %vm963_vm13 = vcmp.eq.f32.partialorder %v962_v37, 8.507059e+37 }
 0x191   : > { %v912_v63 = vadd.f32 %v2580_v17, %v911_v50  ;;  %v926_v7 = vmul.f32 %v2607_v38, %v925_v54  ;;  %v950_v16 = vor.u32 1.1754944e-38, %v949_v53  ;;  %v1998_v54 = vmul.f32 -1.442695, %v2642_v58 }
 0x192   : > { %v2618_v45 = vpop.eup %2135  ;;  %v942_v2 = vadd.f32 %v2583_v20, %v941_v51 }
 0x193   : > { %v954_v52 = vmul.f32 %v2618_v45, %v2575_v13  ;;  %v916_v9 = vsel %vm2651_vm1, %v2580_v17, %v912_v63  ;;  %v927_v22 = vadd.f32 %v2607_v38, %v926_v7  ;;  %vm959_vm7 = vweird.f32 %v2618_v45 }
 0x194   : > { %v2669_v18 = vsel %vm918_vm4, %v920_v6, %v916_v9  ;;  %vm960_vm11 = vmor %vm958_vm10, %vm959_vm7 }
 0x195   : > { %v955_v3 = vsub.f32 1.0, %v954_v52  ;;  %v1997_v52 = vmul.f32 -1.442695, %v2602_v32 }
 0x196   : > { %v2567_v4 = vpop.f32.mrf.mxu2 }
 0x197   : > { %v956_v15 = vmul.f32 %v2618_v45, %v955_v3  ;;  %v2673_v21 = vadd.f32 %v2504_v19, %v2567_v4  ;;  %v932_v4 = vand.u32 2147483647, %v2571_v10  ;;  %v931_v10 = vsel %vm930_vm9, %v2607_v38, %v927_v22 }
 0x198   : > { %2137 = vpow2.f32 %v1997_v52 }
 0x199   : > { %v957_v28 = vadd.f32 %v2618_v45, %v956_v15  ;;  %vm933_vm12 = vcmp.eq.f32.partialorder %v932_v4, 8.507059e+37  ;;  %2139 = vpow2.f32 %v1998_v54  ;;  %v1999_v0 = vmul.f32 -1.442695, %v2673_v21 }
 0x19a   : > { %v2702_v44 = vsel %vm933_vm12, %v935_v40, %v931_v10 }
 0x19b   : > { %v961_v41 = vsel %vm960_vm11, %v2618_v45, %v957_v28 }
 0x19e   : > { %v2596_v30 = vpop.f32.mrf.mxu2  ;;  %v2138_v57 = vpop.eup %2137 }
 0x19f   : > { %v2706_v47 = vadd.f32 %v2504_v19, %v2596_v30  ;;  %v854_v63 = vadd.f32 1.0, %v2138_v57  ;;  %v2140_v3 = vpop.eup %2139 }
 0x1a0   : > { %v2753_v53 = vadd.f32 1.0, %v2140_v3 }
 0x1a1   : > { %v2000_v7 = vmul.f32 -1.442695, %v2706_v47  ;;  %vm973_vm15 = vweird.f32 %v854_v63  ;;  %v977_v54 = vand.u32 2147483647, %v854_v63 }
 0x1a3   : > { %vm978_vm2 = vcmp.eq.f32.partialorder %v977_v54, 8.507059e+37 }
 0x1a6   : > { %v786_v61 = vpop.f32.mrf.mxu2 }
 0x1c3   : > { %v1120_v11 = vpop.permute.xlu0 %1119 }
 0x1c4   : > { %v2578_v14 = vmul.f32 %v1120_v11, %v2573_v12  ;;  %v946_v11 = vsel %vm945_vm3, %v2583_v20, %v942_v2  ;;  %v789_v20 = vpop.f32.mrf.mxu2  ;;  %v2051_v2 = vld [vmem:[%s3348_s7] sm:$0xff]  ;;  %vm988_vm3 = vweird.f32 %v2753_v53 }
 0x1c5   : > { %v2676_v23 = vsel %vm948_vm6, %v950_v16, %v946_v11  ;;  %v2734_v50 = vadd.f32 %v2504_v19, %v789_v20 }
 0x1c6   : > { %1199 = vrot.lane.b32.xlu0 %v2578_v14, %s2270_s25 }
 0x1c7   : > { %v2002_v11 = vmul.f32 -1.442695, %v2734_v50 }
 0x1cb   : > { %v1122_v36 = vpop.permute.xlu0 %1121  ;;  %v2620_v46 = vpop.permute.xlu2 %1127 }
 0x1cc   : > { %v2610_v39 = vmul.f32 %v1122_v36, %v2604_v34  ;;  %v964_v36 = vand.u32 2147483648, %v2575_v13  ;;  %v2710_v13 = vmul.f32 %v2620_v46, %v2702_v44  ;;  %v791_v45 = vpop.f32.mrf.mxu2  ;;  %v2727_v46 = vadd.f32 %v2504_v19, %v786_v61 }
 0x1cd   : > { %v2724_v30 = vadd.f32 %v2504_v19, %v791_v45  ;;  %v979_v45 = vand.u32 2147483648, %v854_v63 }
 0x1ce   : > { %1201 = vrot.lane.b32.xlu1 %v2610_v39, %s2270_s25  ;;  %1133 = vrot.lane.b32.xlu0 %v2602_v32, %s2269_s24  ;;  %v965_v42 = vor.u32 1.1754944e-38, %v964_v36  ;;  %v2001_v61 = vmul.f32 -1.442695, %v2727_v46 }
 0x1cf   : > { %v2003_v4 = vmul.f32 -1.442695, %v2724_v30 }
 0x1d0   : > { %v2712_v48 = vsel %vm963_vm13, %v965_v42, %v961_v41  ;;  %2141 = vpow2.f32 %v2001_v61 }
 0x1d1   : > { %2143 = vrcp.f32 %v854_v63 }
 0x1d2   : > { %2145 = vpow2.f32 %v1999_v0 }
 0x1d3   : > { %v1124_v55 = vpop.permute.xlu1 %1123  ;;  %v1130_v8 = vpop.permute.xlu2 %1129  ;;  %2147 = vrcp.f32 %v2753_v53 }
 0x1d4   : > { %v2645_v62 = vmul.f32 %v1124_v55, %v2637_v56  ;;  %v2683_v26 = vmul.f32 %v1130_v8, %v2676_v23  ;;  %v794_v49 = vpop.f32.mrf.mxu2  ;;  %v2052_v55 = vld [vmem:[%s3348_s7 + $0x8] sm:$0xff] }
 0x1d5   : > { %v2737_v51 = vadd.f32 %v2504_v19, %v794_v49  ;;  %1321 = vmatpush.bf16.msrb.mxu3 %v2052_v55 }
 0x1d6   : > { %1203 = vrot.lane.b32.xlu1 %v2645_v62, %s2270_s25  ;;  %1135 = vrot.lane.b32.xlu0 %v2642_v58, %s2269_s24  ;;  %v2142_v5 = vpop.eup %2141 }
 0x1d7   : > { %v2144_v59 = vpop.eup %2143  ;;  %v2755_v6 = vadd.f32 1.0, %v2142_v5  ;;  %v2004_v0 = vmul.f32 -1.442695, %v2737_v51 }
 0x1d8   : > { %v969_v8 = vmul.f32 %v2144_v59, %v854_v63  ;;  %v2146_v9 = vpop.eup %2145  ;;  %vm974_vm14 = vweird.f32 %v2144_v59 }
 0x1d9   : > { %1322 = vmatpush.bf16.msrb.mxu3 %v2051_v2  ;;  %2149 = vrcp.f32 %v2755_v6  ;;  %v2761_v15 = vadd.f32 1.0, %v2146_v9  ;;  %vm975_vm1 = vmor %vm973_vm15, %vm974_vm14  ;;  %v980_v2 = vor.u32 1.1754944e-38, %v979_v45  ;;  %vm1033_vm5 = vweird.f32 %v2755_v6 }
 0x1da   : > { %2151 = vpow2.f32 %v2000_v7  ;;  %v970_v16 = vsub.f32 1.0, %v969_v8  ;;  %v994_v8 = vand.u32 2147483648, %v2753_v53 }
 0x1db   : > { %v1126_v60 = vpop.permute.xlu1 %1125  ;;  %v1132_v43 = vpop.permute.xlu2 %1131  ;;  %2153 = vpow2.f32 %v2002_v11  ;;  %vm1003_vm11 = vweird.f32 %v2761_v15 }
 0x1dc   : > { %v2679_v17 = vmul.f32 %v1126_v60, %v2669_v18  ;;  %v2715_v38 = vmul.f32 %v1132_v43, %v2712_v48  ;;  %v2763_v60 = vpop.eup %2147  ;;  %2155 = vrcp.f32 %v2761_v15  ;;  %v971_v20 = vmul.f32 %v2144_v59, %v970_v16 }
 0x1dd   : > { %v984_v25 = vmul.f32 %v2763_v60, %v2753_v53  ;;  %2157 = vpow2.f32 %v2003_v4  ;;  %vm989_vm4 = vweird.f32 %v2763_v60  ;;  %v1037_v16 = vand.u32 2147483647, %v2755_v6 }
 0x1de   : > { %1205 = vrot.lane.b32.xlu2 %v2679_v17, %s2270_s25  ;;  %1137 = vrot.lane.b32.xlu1 %v2673_v21, %s2269_s24  ;;  %v972_v40 = vadd.f32 %v2144_v59, %v971_v20  ;;  %v1039_v20 = vand.u32 2147483648, %v2755_v6  ;;  %vm2811_vm7 = vmor %vm988_vm3, %vm989_vm4 }
 0x1df   : > { %1209 = vrot.lane.b32.xlu0 %v2683_v26, %s2270_s25  ;;  %v2765_v22 = vpop.eup %2149  ;;  %v985_v41 = vsub.f32 1.0, %v984_v25  ;;  %vm1038_vm9 = vcmp.eq.f32.partialorder %v1037_v16, 8.507059e+37 }
 0x1e0   : > { %v2152_v28 = vpop.eup %2151  ;;  %v1029_v36 = vmul.f32 %v2765_v22, %v2755_v6  ;;  %v976_v57 = vsel %vm975_vm1, %v2144_v59, %v972_v40  ;;  %vm1034_vm6 = vweird.f32 %v2765_v22 }
 0x1e1   : > { %v2154_v37 = vpop.eup %2153  ;;  %v2773_v10 = vadd.f32 1.0, %v2152_v28  ;;  %v986_v61 = vmul.f32 %v2763_v60, %v985_v41  ;;  %v2788_v63 = vsel %vm978_vm2, %v980_v2, %v976_v57  ;;  %vm2822_vm8 = vmor %vm1033_vm5, %vm1034_vm6  ;;  %v995_v2 = vor.u32 1.1754944e-38, %v994_v8 }
 0x1e2   : > { %v2777_v49 = vpop.eup %2155  ;;  %v2779_v52 = vadd.f32 1.0, %v2154_v37  ;;  %v1030_v55 = vsub.f32 1.0, %v1029_v36 }
 0x1e3   : > { %2159 = vrcp.f32 %v2773_v10  ;;  %v999_v3 = vmul.f32 %v2777_v49, %v2761_v15  ;;  %v2158_v7 = vpop.eup %2157  ;;  %v987_v59 = vadd.f32 %v2763_v60, %v986_v61  ;;  %vm1004_vm12 = vweird.f32 %v2777_v49 }
 0x1e4   : > { %2161 = vrcp.f32 %v2779_v52  ;;  %v1031_v5 = vmul.f32 %v2765_v22, %v1030_v55  ;;  %v2802_v4 = vadd.f32 1.0, %v2158_v7  ;;  %v992_v55 = vand.u32 2147483647, %v2753_v53  ;;  %vm2858_vm13 = vmor %vm1003_vm11, %vm1004_vm12 }
 0x1e5   : > { %2163 = vpow2.f32 %v2004_v0  ;;  %v1000_v25 = vsub.f32 1.0, %v999_v3  ;;  %v1040_v0 = vor.u32 1.1754944e-38, %v1039_v20  ;;  %v991_v6 = vsel %vm2811_vm7, %v2763_v60, %v987_v59 }
 0x1e6   : > { %1207 = vrot.lane.b32.xlu2 %v2710_v13, %s2270_s25  ;;  %1139 = vrot.lane.b32.xlu1 %v2706_v47, %s2269_s24  ;;  %v1032_v41 = vadd.f32 %v2765_v22, %v1031_v5  ;;  %2165 = vrcp.f32 %v2802_v4  ;;  %vm993_vm10 = vcmp.eq.f32.partialorder %v992_v55, 8.507059e+37  ;;  %vm1018_vm15 = vweird.f32 %v2773_v10 }
 0x1e7   : > { %1211 = vrot.lane.b32.xlu0 %v2715_v38, %s2270_s25  ;;  %v1001_v3 = vmul.f32 %v2777_v49, %v1000_v25  ;;  %vm1048_vm2 = vweird.f32 %v2779_v52 }
 0x1e8   : > { %v1036_v53 = vsel %vm2822_vm8, %v2765_v22, %v1032_v41  ;;  %vm1063_vm8 = vweird.f32 %v2802_v4 }
 0x1e9   : > { %v2800_v28 = vpop.eup %2159  ;;  %v2847_v20 = vsel %vm1038_vm9, %v1040_v0, %v1036_v53  ;;  %v1002_v16 = vadd.f32 %v2777_v49, %v1001_v3  ;;  %v796_v53 = vpop.f32.mrf.mxu2 }
 0x1ea   : > { %v2827_v57 = vpop.eup %2161  ;;  %v1014_v5 = vmul.f32 %v2800_v28, %v2773_v10  ;;  %vm1019_vm1 = vweird.f32 %v2800_v28 }
 0x1eb   : > { %v2164_v7 = vpop.eup %2163  ;;  %v1044_v8 = vmul.f32 %v2827_v57, %v2779_v52  ;;  %v1006_v0 = vsel %vm2858_vm13, %v2777_v49, %v1002_v16  ;;  %vm1049_vm3 = vweird.f32 %v2827_v57  ;;  %vm2902_vm4 = vmor %vm1018_vm15, %vm1019_vm1 }
 0x1ec   : > { %v1015_v60 = vsub.f32 1.0, %v1014_v5  ;;  %v2851_v59 = vadd.f32 1.0, %v2164_v7  ;;  %vm2910_vm5 = vmor %vm1048_vm2, %vm1049_vm3 }
 0x1ed   : > { %v1045_v55 = vsub.f32 1.0, %v1044_v8 }
 0x1ee   : > { %1141 = vrot.lane.b32.xlu2 %v2727_v46, %s2269_s24  ;;  %2167 = vrcp.f32 %v2851_v59  ;;  %vm1078_vm12 = vweird.f32 %v2851_v59 }
 0x1ef   : > { %1145 = vrot.lane.b32.xlu0 %v2724_v30, %s2269_s24  ;;  %v1046_v3 = vmul.f32 %v2827_v57, %v1045_v55  ;;  %v1052_v55 = vand.u32 2147483647, %v2779_v52 }
 0x1f1   : > { %v1047_v45 = vadd.f32 %v2827_v57, %v1046_v3  ;;  %vm1053_vm7 = vcmp.eq.f32.partialorder %v1052_v55, 8.507059e+37  ;;  %v1067_v55 = vand.u32 2147483647, %v2802_v4 }
 0x1f3   : > { %vm1068_vm11 = vcmp.eq.f32.partialorder %v1067_v55, 8.507059e+37 }
 0x1f6   : > { %1143 = vrot.lane.b32.xlu2 %v2734_v50, %s2269_s24 }
 0x1f7   : > { %1147 = vrot.lane.b32.xlu0 %v2737_v51, %s2269_s24 }
 0x238   : > { %v2775_v42 = vpop.permute.xlu2 %1205  ;;  %v1200_v43 = vpop.permute.xlu0 %1199 }
 0x239   : > { %v1247_v36 = vadd.f32 %v1200_v43, %v2507_v24 }
 0x240   : > { %v2796_v9 = vpop.permute.xlu2 %1207  ;;  %v1202_v11 = vpop.permute.xlu1 %1201 }
 0x241   : > { %v1248_v37 = vadd.f32 %v1202_v11, %v2512_v1  ;;  %v1134_v40 = vpop.permute.xlu0 %1133  ;;  %v1009_v11 = vand.u32 2147483648, %v2761_v15 }
 0x242   : > { %v2816_v54 = vmul.f32 %v1134_v40, %v2788_v63  ;;  %v2856_v40 = vsel %vm993_vm10, %v995_v2, %v991_v6  ;;  %v1016_v2 = vmul.f32 %v2800_v28, %v1015_v60  ;;  %v1022_v60 = vand.u32 2147483647, %v2773_v10 }
 0x243   : > { %v1263_v61 = vpack.c.bf16 %v1248_v37, %v1247_v36  ;;  %v1007_v36 = vand.u32 2147483647, %v2761_v15  ;;  %v1010_v15 = vor.u32 1.1754944e-38, %v1009_v11  ;;  %v1024_v11 = vand.u32 2147483648, %v2773_v10 }
 0x244   : > { %1213 = vrot.lane.b32.xlu1 %v2816_v54, %s2270_s25  ;;  %v1017_v8 = vadd.f32 %v2800_v28, %v1016_v2  ;;  %vm1023_vm6 = vcmp.eq.f32.partialorder %v1022_v60, 8.507059e+37 }
 0x245   : > { %2014 = vmatmul.msk.bf16.vlgmr.msrb.gmra.mxu3 %vm479_vm0, %v1263_v61  ;;  %v2865_v61 = vpop.eup %2165  ;;  %vm1008_vm14 = vcmp.eq.f32.partialorder %v1007_v36, 8.507059e+37  ;;  %v1025_v10 = vor.u32 1.1754944e-38, %v1024_v11 }
 0x246   : > { %v1059_v5 = vmul.f32 %v2865_v61, %v2802_v4  ;;  %v2880_v7 = vsel %vm1008_vm14, %v1010_v15, %v1006_v0  ;;  %v2168_v0 = vpop.eup %2167  ;;  %vm1064_vm9 = vweird.f32 %v2865_v61 }
 0x247   : > { %vm1065_vm10 = vmor %vm1063_vm8, %vm1064_vm9  ;;  %vm1079_vm13 = vweird.f32 %v2168_v0 }
 0x248   : > { %v1142_v25 = vpop.permute.xlu2 %1141  ;;  %v1204_v22 = vpop.permute.xlu1 %1203  ;;  %vm1080_vm14 = vmor %vm1078_vm12, %vm1079_vm13 }
 0x249   : > { %v2854_v37 = vmul.f32 %v1142_v25, %v2847_v20  ;;  %v1136_v41 = vpop.permute.xlu0 %1135  ;;  %v1249_v6 = vadd.f32 %v1204_v22, %v2517_v27  ;;  %v1250_v25 = vadd.f32 %v2775_v42, %v2522_v29  ;;  %v1054_v22 = vand.u32 2147483648, %v2779_v52 }
 0x24a   : > { %v2863_v43 = vmul.f32 %v1136_v41, %v2856_v40  ;;  %v2896_v41 = vadd.f32 %v2504_v19, %v796_v53  ;;  %v1060_v42 = vsub.f32 1.0, %v1059_v5  ;;  %v1021_v5 = vsel %vm2902_vm4, %v2800_v28, %v1017_v8 }
 0x24b   : > { %1221 = vrot.lane.b32.xlu0 %v2854_v37, %s2270_s25  ;;  %v1264_v2 = vpack.c.bf16 %v1250_v25, %v1249_v6  ;;  %v1055_v3 = vor.u32 1.1754944e-38, %v1054_v22  ;;  %v1051_v52 = vsel %vm2910_vm5, %v2827_v57, %v1047_v45  ;;  %v1074_v6 = vmul.f32 %v2168_v0, %v2851_v59 }
 0x24c   : > { %1215 = vrot.lane.b32.xlu1 %v2863_v43, %s2270_s25  ;;  %v1061_v53 = vmul.f32 %v2865_v61, %v1060_v42  ;;  %v2927_v25 = vsel %vm1023_vm6, %v1025_v10, %v1021_v5  ;;  %v1069_v57 = vand.u32 2147483648, %v2802_v4  ;;  %vm1400_vm5 = vcmask 130048  }
 0x24d   : > { %v2931_v22 = vsel %vm1053_vm7, %v1055_v3, %v1051_v52  ;;  %v1075_v15 = vsub.f32 1.0, %v1074_v6  ;;  %v1251_v3 = vadd.f32 %v2796_v9, %v2527_v31  ;;  %v1084_v52 = vand.u32 2147483648, %v2851_v59 }
 0x24e   : > { %v1062_v45 = vadd.f32 %v2865_v61, %v1061_v53  ;;  %v1070_v42 = vor.u32 1.1754944e-38, %v1069_v57  ;;  %vm1794_vm6 = vcmask 392192  }
 0x24f   : > { %v1076_v19 = vmul.f32 %v2168_v0, %v1075_v15  ;;  %v1480_v15 = vmul.f32 %v2715_v38, %v2715_v38  ;;  %v2005_v38 = vmul.f32 -1.442695, %v2896_v41 }
 0x250   : > { %v1138_v49 = vpop.permute.xlu1 %1137 }
 0x251   : > { %v2892_v16 = vmul.f32 %v1138_v49, %v2880_v7  ;;  %v1210_v36 = vpop.permute.xlu0 %1209  ;;  %v1144_v49 = vpop.permute.xlu2 %1143  ;;  %v1077_v6 = vadd.f32 %v2168_v0, %v1076_v19  ;;  %2169 = vpow2.f32 %v2005_v38 }
 0x252   : > { %v1179_v60 = vmul.f32 %v1144_v49, %v2931_v22  ;;  %v1252_v10 = vadd.f32 %v1210_v36, %v2532_v33  ;;  %v1085_v36 = vor.u32 1.1754944e-38, %v1084_v52 }
 0x253   : > { %1217 = vrot.lane.b32.xlu2 %v2892_v16, %s2270_s25 }
 0x254   : > { %1149 = vrot.lane.b32.xlu1 %v2896_v41, %s2269_s24  ;;  %v1265_v49 = vpack.c.bf16 %v1252_v10, %v1251_v3  ;;  %v1604_v3 = vmul.f32 %v2517_v27, %v2517_v27  ;;  %v1607_v27 = vmul.f32 %v2532_v33, %v2532_v33  ;;  %s2271_s24 = smov 80  }
 0x255   : > { %2015 = vmatmul.msk.bf16.gmra.mxu3 %vm479_vm0, %v1264_v2  ;;  %v1066_v2 = vsel %vm1065_vm10, %v2865_v61, %v1062_v45  ;;  %v1082_v61 = vand.u32 2147483647, %v2851_v59  ;;  %v1474_v45 = vmul.f32 %v2578_v14, %v2578_v14  ;;  %v1475_v59 = vmul.f32 %v2610_v39, %v2610_v39 }
 0x256   : > { %v2947_v4 = vsel %vm1068_vm11, %v1070_v42, %v1066_v2  ;;  %v1478_v14 = vmul.f32 %v2710_v13, %v2710_v13  ;;  %v1481_v39 = vmul.f32 %v2816_v54, %v2816_v54  ;;  %v1486_v42 = vmul.f32 %v1179_v60, %v1179_v60 }
 0x257   : > { %vm1083_vm15 = vcmp.eq.f32.partialorder %v1082_v61, 8.507059e+37  ;;  %v2170_v54 = vpop.eup %2169 }
 0x258   : > { %v1140_v11 = vpop.permute.xlu1 %1139  ;;  %v862_v19 = vadd.f32 1.0, %v2170_v54 }
 0x259   : > { %v1177_v28 = vmul.f32 %v1140_v11, %v2927_v25  ;;  %v2934_v8 = vpop.permute.xlu0 %1211  ;;  %v1081_v11 = vsel %vm1080_vm14, %v2168_v0, %v1077_v6  ;;  %v1477_v0 = vmul.f32 %v2679_v17, %v2679_v17  ;;  %v1483_v17 = vmul.f32 %v2892_v16, %v2892_v16 }
 0x25a   : > { %v2954_v9 = vsel %vm1083_vm15, %v1085_v36, %v1081_v11  ;;  %2171 = vrcp.f32 %v862_v19  ;;  %v1253_v6 = vadd.f32 %v2934_v8, %v2537_v35  ;;  %vm1093_vm1 = vweird.f32 %v862_v19 }
 0x25b   : > { %1219 = vrot.lane.b32.xlu2 %v1177_v28, %s2270_s25  ;;  %v1484_v2 = vmul.f32 %v1177_v28, %v1177_v28  ;;  %v1624_v28 = vsel %vm479_vm0, %v1604_v3, 0.0 }
 0x25c   : > { %1223 = vrot.lane.b32.xlu1 %v1179_v60, %s2270_s25 }
 0x260   : > { %v2172_v10 = vpop.eup %2171 }
 0x261   : > { %v1146_v5 = vpop.permute.xlu0 %1145  ;;  %v1089_v60 = vmul.f32 %v2172_v10, %v862_v19  ;;  %vm1094_vm2 = vweird.f32 %v2172_v10 }
 0x262   : > { %v1180_v53 = vmul.f32 %v1146_v5, %v2947_v4  ;;  %v2053_v5 = vld [vmem:[%s3350_s9] sm:$0xff]  ;;  %vm1095_vm3 = vmor %vm1093_vm1, %vm1094_vm2 }
 0x263   : > { %1432 = vmatpush.bf16.msrb.mxu0 %v2053_v5 }
 0x264   : > { %1225 = vrot.lane.b32.xlu2 %v1180_v53, %s2270_s25  ;;  %v1487_v13 = vmul.f32 %v1180_v53, %v1180_v53 }
 0x265   : > { %2016 = vmatmul.msk.bf16.gmra.mxu3 %vm479_vm0, %v1265_v49  ;;  %v1090_v49 = vsub.f32 1.0, %v1089_v60 }
 0x267   : > { %v1091_v11 = vmul.f32 %v2172_v10, %v1090_v49 }
 0x269   : > { %v1148_v57 = vpop.permute.xlu0 %1147  ;;  %v1092_v8 = vadd.f32 %v2172_v10, %v1091_v11 }
 0x26a   : > { %v2959_v55 = vmul.f32 %v1148_v57, %v2954_v9  ;;  %v1633_v57 = vsel %vm479_vm0, %v1607_v27, 0.0  ;;  %v1616_v27 = vmul.f32 %v2737_v51, %v2737_v51 }
 0x26c   : > { %1227 = vrot.lane.b32.xlu0 %v2959_v55, %s2270_s25  ;;  %1506 = vrot.lane.b32.xlu2 %v1474_v45, %s2270_s25 }
 0x274   : > { %1508 = vrot.lane.b32.xlu0 %v1475_v59, %s2270_s25  ;;  %1512 = vrot.lane.b32.xlu2 %v1477_v0, %s2270_s25  ;;  %v1099_v0 = vand.u32 2147483648, %v862_v19 }
 0x276   : > { %v1100_v33 = vor.u32 1.1754944e-38, %v1099_v0 }
 0x27c   : > { %1514 = vrot.lane.b32.xlu0 %v1478_v14, %s2270_s25  ;;  %1518 = vrot.lane.b32.xlu2 %v1480_v15, %s2270_s25  ;;  %v1097_v14 = vand.u32 2147483647, %v862_v19  ;;  %v1610_v15 = vmul.f32 %v2642_v58, %v2642_v58 }
 0x27e   : > { %vm1098_vm4 = vcmp.eq.f32.partialorder %v1097_v14, 8.507059e+37  ;;  %v1479_v14 = vmul.f32 %v2683_v26, %v2683_v26 }
 0x284   : > { %1520 = vrot.lane.b32.xlu0 %v1481_v39, %s2270_s25  ;;  %1524 = vrot.lane.b32.xlu2 %v1483_v17, %s2270_s25  ;;  %v1096_v39 = vsel %vm1095_vm3, %v2172_v10, %v1092_v8  ;;  %v1642_v17 = vsel %vm479_vm0, %v1610_v15, 0.0  ;;  %v1613_v10 = vmul.f32 %v2727_v46, %v2727_v46 }
 0x286   : > { %v1651_v5 = vsel %vm479_vm0, %v1613_v10, 0.0 }
 0x28c   : > { %1526 = vrot.lane.b32.xlu0 %v1484_v2, %s2270_s25  ;;  %1530 = vrot.lane.b32.xlu2 %v1486_v42, %s2270_s25  ;;  %v3005_v2 = vsel %vm1098_vm4, %v1100_v33, %v1096_v39 }
 0x294   : > { %1532 = vrot.lane.b32.xlu0 %v1487_v13, %s2270_s25 }
 0x2ad   : > { %v1218_v16 = vpop.permute.xlu2 %1217 }
 0x2ae   : > { %v1256_v54 = vadd.f32 %v1218_v16, %v2673_v21  ;;  %v1602_v16 = vmul.f32 %v2507_v24, %v2507_v24 }
 0x2b5   : > { %1625 = vadd.xlane.f32.xlu2 %v1624_v28  ;;  %v1220_v52 = vpop.permute.xlu2 %1219 }
 0x2b6   : > { %v1214_v53 = vpop.permute.xlu1 %1213  ;;  %v1257_v15 = vadd.f32 %v1220_v52, %v2706_v47 }
 0x2b7   : > { %v1254_v61 = vadd.f32 %v1214_v53, %v2602_v32  ;;  %v1476_v53 = vmul.f32 %v2645_v62, %v2645_v62  ;;  %v1660_v62 = vsel %vm479_vm0, %v1616_v27, 0.0 }
 0x2b9   : > { %v1266_v36 = vpack.c.bf16 %v1254_v61, %v1253_v6  ;;  %v1618_v61 = vsel %vm479_vm0, %v1602_v16, 0.0 }
 0x2bb   : > { %2017 = vmatmul.msk.bf16.gmra.mxu3 %vm479_vm0, %v1266_v36 }
 0x2bd   : > { %1634 = vadd.xlane.f32.xlu2 %v1633_v57  ;;  %v1222_v24 = vpop.permute.xlu0 %1221 }
 0x2be   : > { %v1216_v45 = vpop.permute.xlu1 %1215  ;;  %v2999_v59 = vpop.permute.xlu2 %1225  ;;  %v1258_v0 = vadd.f32 %v1222_v24, %v2727_v46  ;;  %v1482_v46 = vmul.f32 %v2863_v43, %v2863_v43  ;;  %v1485_v43 = vmul.f32 %v2854_v37, %v2854_v37  ;;  %v1488_v37 = vmul.f32 %v2959_v55, %v2959_v55 }
 0x2bf   : > { %v1255_v42 = vadd.f32 %v1216_v45, %v2642_v58  ;;  %v3019_v58 = vld [vmem:[%s3349_s8] ss:$0 sm:$0xff]  ;;  %v1605_v45 = vmul.f32 %v2522_v29, %v2522_v29  ;;  %v1608_v29 = vmul.f32 %v2537_v35, %v2537_v35 }
 0x2c1   : > { %v1267_v28 = vpack.c.bf16 %v1256_v54, %v1255_v42  ;;  %v1627_v33 = vsel %vm479_vm0, %v1605_v45, 0.0  ;;  %v1636_v52 = vsel %vm479_vm0, %v1608_v29, 0.0 }
 0x2c5   : > { %1643 = vadd.xlane.f32.xlu2 %v1642_v17  ;;  %v1268_v17 = vpack.c.bf16 %v1258_v0, %v1257_v15 }
 0x2c6   : > { %v1150_v13 = vpop.permute.xlu1 %1149  ;;  %v1507_v38 = vpop.permute.xlu2 %1506 }
 0x2c7   : > { %v3009_v19 = vmul.f32 %v1150_v13, %v3005_v2  ;;  %v1554_v3 = vsel %vm479_vm0, %v1507_v38, 0.0 }
 0x2c8   : > { %1555 = vadd.xlane.f32.xlu0 %v1554_v3  ;;  %v1324_v60 = vpop.f32.mrf.mxu3 }
 0x2c9   : > { %1229 = vrot.lane.b32.xlu1 %v3009_v19, %s2270_s25  ;;  %v1325_v6 = vadd.f32 %v3019_v58, %v1324_v60  ;;  %v1611_v60 = vmul.f32 %v2673_v21, %v2673_v21  ;;  %v1614_v21 = vmul.f32 %v2734_v50, %v2734_v50 }
 0x2cb   : > { %2018 = vmatmul.msk.bf16.gmra.mxu3 %vm479_vm0, %v1267_v28  ;;  %v1364_v11 = vmax.f32 %v1325_v6, 0.0  ;;  %v1260_v28 = vadd.f32 %v2999_v59, %v2724_v30  ;;  %v1645_v16 = vsel %vm479_vm0, %v1611_v60, 0.0  ;;  %v1654_v6 = vsel %vm479_vm0, %v1614_v21, 0.0 }
 0x2cd   : > { %1652 = vadd.xlane.f32.xlu2 %v1651_v5 }
 0x2ce   : > { %v1224_v38 = vpop.permute.xlu1 %1223 }
 0x2cf   : > { %v1259_v35 = vadd.f32 %v1224_v38, %v2734_v50  ;;  %v1617_v50 = vmul.f32 %v2896_v41, %v2896_v41 }
 0x2d0   : > { %1619 = vadd.xlane.f32.xlu0 %v1618_v61  ;;  %v1326_v49 = vpop.f32.mrf.mxu3 }
 0x2d1   : > { %v1327_v36 = vadd.f32 %v3019_v58, %v1326_v49  ;;  %1510 = vrot.lane.b32.xlu1 %v1476_v53, %s2270_s25  ;;  %v1269_v53 = vpack.c.bf16 %v1260_v28, %v1259_v35 }
 0x2d3   : > { %v1365_v57 = vmax.f32 %v1327_v36, 0.0 }
 0x2d5   : > { %v1380_v8 = vpack.c.bf16 %v1365_v57, %v1364_v11  ;;  %1661 = vadd.xlane.f32.xlu2 %v1660_v62  ;;  %v1513_v11 = vpop.permute.xlu2 %1512  ;;  %v1489_v57 = vmul.f32 %v3009_v19, %v3009_v19 }
 0x2d7   : > { %2026 = vmatmul.msk.bf16.vlgmr.msrb.gmra.mxu0 %vm1400_vm5, %v1380_v8 }
 0x2d8   : > { %1628 = vadd.xlane.f32.xlu0 %v1627_v33  ;;  %v1329_v39 = vpop.f32.mrf.mxu3 }
 0x2d9   : > { %1516 = vrot.lane.b32.xlu1 %v1479_v14, %s2270_s25  ;;  %v1330_v26 = vadd.f32 %v3019_v58, %v1329_v39 }
 0x2db   : > { %2019 = vmatmul.msk.bf16.gmra.mxu3 %vm479_vm0, %v1268_v17  ;;  %v1366_v54 = vmax.f32 %v1330_v26, 0.0 }
 0x2dd   : > { %v1519_v62 = vpop.permute.xlu2 %1518 }
 0x2de   : > { %v1228_v55 = vpop.permute.xlu0 %1227 }
 0x2e0   : > { %1637 = vadd.xlane.f32.xlu0 %v1636_v52  ;;  %v1331_v42 = vpop.f32.mrf.mxu3  ;;  %v1261_v52 = vadd.f32 %v1228_v55, %v2737_v51 }
 0x2e1   : > { %v1332_v13 = vadd.f32 %v3019_v58, %v1331_v42  ;;  %1522 = vrot.lane.b32.xlu1 %v1482_v46, %s2270_s25 }
 0x2e3   : > { %v1367_v3 = vmax.f32 %v1332_v13, 0.0 }
 0x2e5   : > { %v1381_v10 = vpack.c.bf16 %v1367_v3, %v1366_v54 }
 0x2e6   : > { %v3085_v45 = vpop.permute.xlu0 %1508 }
 0x2e7   : > { %2027 = vmatmul.msk.bf16.gmra.mxu0 %vm1400_vm5, %v1381_v10 }
 0x2e8   : > { %1646 = vadd.xlane.f32.xlu0 %v1645_v16  ;;  %v1334_v5 = vpop.f32.mrf.mxu3 }
 0x2e9   : > { %1528 = vrot.lane.b32.xlu1 %v1485_v43, %s2270_s25  ;;  %v1335_v59 = vadd.f32 %v3019_v58, %v1334_v5 }
 0x2eb   : > { %2020 = vmatmul.msk.bf16.gmra.mxu3 %vm479_vm0, %v1269_v53  ;;  %v1368_v27 = vmax.f32 %v1335_v59, 0.0  ;;  %v1563_v53 = vsel %vm479_vm0, %v1513_v11, 0.0 }
 0x2ed   : > { %1732 = vrot.lane.b32.xlu2 %v2604_v34, %s2271_s24  ;;  %v1663_v34 = vsel %vm479_vm0, %v1617_v50, 0.0 }
 0x2f0   : > { %1655 = vadd.xlane.f32.xlu0 %v1654_v6  ;;  %v1336_v61 = vpop.f32.mrf.mxu3 }
 0x2f1   : > { %v1337_v49 = vadd.f32 %v3019_v58, %v1336_v61  ;;  %1534 = vrot.lane.b32.xlu1 %v1488_v37, %s2270_s25 }
 0x2f3   : > { %v1369_v36 = vmax.f32 %v1337_v49, 0.0  ;;  %v1572_v49 = vsel %vm479_vm0, %v1519_v62, 0.0 }
 0x2f5   : > { %v1382_v24 = vpack.c.bf16 %v1369_v36, %v1368_v27  ;;  %1740 = vrot.lane.b32.xlu2 %v2676_v23, %s2271_s24  ;;  %v1515_v23 = vpop.permute.xlu0 %1514 }
 0x2f6   : > { %v1566_v37 = vsel %vm479_vm0, %v1515_v23, 0.0 }
 0x2f7   : > { %2028 = vmatmul.msk.bf16.gmra.mxu0 %vm1400_vm5, %v1382_v24 }
 0x2f8   : > { %1664 = vadd.xlane.f32.xlu0 %v1663_v34 }
 0x2fd   : > { %1746 = vrot.lane.b32.xlu2 %v2856_v40, %s2271_s24  ;;  %v3092_v40 = vpop.permute.xlu2 %1524  ;;  %v1521_v19 = vpop.permute.xlu0 %1520 }
 0x2fe   : > { %v1575_v36 = vsel %vm479_vm0, %v1521_v19, 0.0  ;;  %v1581_v23 = vsel %vm479_vm0, %v3092_v40, 0.0 }
 0x305   : > { %1752 = vrot.lane.b32.xlu2 %v2847_v20, %s2271_s24  ;;  %v1603_v20 = vmul.f32 %v2512_v1, %v2512_v1  ;;  %v3101_v8 = vpop.permute.xlu2 %1530  ;;  %v1609_v1 = vmul.f32 %v2602_v32, %v2602_v32  ;;  %v1527_v15 = vpop.permute.xlu0 %1526 }
 0x307   : > { %v1621_v0 = vsel %vm479_vm0, %v1603_v20, 0.0 }
 0x30c   : > { %1734 = vrot.lane.b32.xlu0 %v2637_v56, %s2271_s24  ;;  %v1606_v56 = vmul.f32 %v2527_v31, %v2527_v31  ;;  %v1612_v31 = vmul.f32 %v2706_v47, %v2706_v47 }
 0x30d   : > { %1536 = vrot.lane.b32.xlu2 %v1489_v57, %s2270_s25  ;;  %v3116_v17 = vpop.permute.xlu0 %1532  ;;  %s1842_s25 = sshll.u32 %s1839_s15, 4  ;;  %s1843_s25 = int_to_ptr.hbm [resolvable:$true] %s1842_s25 }
 0x30e   : > { %v1648_v39 = vsel %vm479_vm0, %v1612_v31, 0.0  ;;  %s2219_s30 = sshra.s32 %s1843_s25, 4  ;;  %s2220_s30 = int_to_ptr.hbm [resolvable:$true] %s2219_s30 }
 0x30f   : > { %s2221_s13 = scalar_lea.hbm %s2220_s30, 128  ;;  %p2226_p0 = scmp.lt.s32.totalorder %s2220_s30, %s3352_s11 }
 0x310   : > { %p2222_p11 = scmp.ne.s32.totalorder %s2220_s30, %s2221_s13  ;;  %p2227_p1 = scmp.lt.s32.totalorder %s2225_s29, %s2221_s13 }
 0x312   : > { %p2223_p12 = pnand %p2222_p11, %p2372_p5  ;;  %p2228_p2 = por %p2227_p1, %p2226_p0 }
 0x314   : > { %1738 = vrot.lane.b32.xlu0 %v2702_v44, %s2271_s24  ;;  %v1630_v44 = vsel %vm479_vm0, %v1606_v56, 0.0  ;;  %p2224_p13 = pneg %p2223_p12 }
 0x316   : > { %p2229_p3 = pnand %p2228_p2, %p2224_p13 }
 0x31b   : > { %1622 = vadd.xlane.f32.xlu1 %v1621_v0  ;;  %v1584_v0 = vsel %vm479_vm0, %v1527_v15, 0.0 }
 0x31c   : > { %1744 = vrot.lane.b32.xlu0 %v2788_v63, %s2271_s24  ;;  %v1639_v63 = vsel %vm479_vm0, %v1609_v1, 0.0  ;;  %v1593_v1 = vsel %vm479_vm0, %v3116_v17, 0.0 }
 0x323   : > { %1631 = vadd.xlane.f32.xlu1 %v1630_v44 }
 0x324   : > { %1750 = vrot.lane.b32.xlu0 %v2927_v25, %s2271_s24  ;;  %v1615_v25 = vmul.f32 %v2724_v30, %v2724_v30 }
 0x326   : > { %v1657_v29 = vsel %vm479_vm0, %v1615_v25, 0.0 }
 0x328   : > { %v3108_v14 = vpop.xlane.xlu2 %1625 }
 0x32b   : > { %1640 = vadd.xlane.f32.xlu1 %v1639_v63 }
 0x330   : > { %v3113_v33 = vpop.xlane.xlu2 %1634 }
 0x333   : > { %1649 = vadd.xlane.f32.xlu1 %v1648_v39 }
 0x338   : > { %v3120_v32 = vpop.xlane.xlu2 %1643 }
 0x33b   : > { %v1230_v46 = vpop.permute.xlu1 %1229  ;;  %1658 = vadd.xlane.f32.xlu1 %v1657_v29  ;;  %v1556_v26 = vpop.xlane.xlu0 %1555 }
 0x33c   : > { %v1262_v47 = vadd.f32 %v1230_v46, %v2896_v41 }
 0x33e   : > { %v1270_v42 = vpack.c.bf16 %v1262_v47, %v1261_v52  ;;  %v1339_v13 = vpop.f32.mrf.mxu3 }
 0x33f   : > { %v1340_v35 = vadd.f32 %v3019_v58, %v1339_v13 }
 0x340   : > { %2021 = vmatmul.msk.bf16.gmra.mxu3 %vm479_vm0, %v1270_v42  ;;  %v3126_v38 = vpop.xlane.xlu2 %1652 }
 0x341   : > { %v1370_v41 = vmax.f32 %v1340_v35, 0.0 }
 0x343   : > { %v1511_v54 = vpop.permute.xlu1 %1510  ;;  %v1620_v3 = vpop.xlane.xlu0 %1619 }
 0x344   : > { %v1666_v30 = vadd.f32 %v1620_v3, %v1556_v26  ;;  %v1560_v60 = vsel %vm479_vm0, %v1511_v54, 0.0 }
 0x345   : > { %1561 = vadd.xlane.f32.xlu2 %v1560_v60 }
 0x346   : > { %2173 = vrcp.f32 %v1666_v30  ;;  %v1341_v10 = vpop.f32.mrf.mxu3 }
 0x347   : > { %v1342_v51 = vadd.f32 %v3019_v58, %v1341_v10 }
 0x348   : > { %v3131_v43 = vpop.xlane.xlu2 %1661 }
 0x349   : > { %v1371_v28 = vmax.f32 %v1342_v51, 0.0 }
 0x34b   : > { %v1383_v16 = vpack.c.bf16 %v1371_v28, %v1370_v41  ;;  %v1629_v29 = vpop.xlane.xlu0 %1628 }
 0x34c   : > { %v2174_v5 = vpop.eup %2173 }
 0x34d   : > { %v3134_v21 = vmul.f32 %v2174_v5, %v1556_v26  ;;  %2029 = vmatmul.msk.bf16.gmra.mxu0 %vm1400_vm5, %v1383_v16  ;;  %1564 = vadd.xlane.f32.xlu2 %v1563_v53 }
 0x34e   : > { %v1344_v59 = vpop.f32.mrf.mxu3  ;;  %1567 = vadd.xlane.f32.xlu0 %v1566_v37 }
 0x34f   : > { %v1345_v27 = vadd.f32 %v3019_v58, %v1344_v59 }
 0x350   : > { %v1733_v6 = vpop.permute.xlu2 %1732 }
 0x351   : > { %v1372_v55 = vmax.f32 %v1345_v27, 0.0 }
 0x353   : > { %v3181_v52 = vpop.xlane.xlu0 %1637 }
 0x354   : > { %1730 = vrot.lane.b32.xlu1 %v2573_v12, %s2271_s24  ;;  %v3140_v61 = vpop.f32.mrf.mxu0  ;;  %v3151_v12 = vld [vmem:[%s3351_s10] ss:$0 sm:$0xff] }
 0x355   : > { %1573 = vadd.xlane.f32.xlu2 %v1572_v49 }
 0x356   : > { %v1346_v50 = vpop.f32.mrf.mxu3  ;;  %1576 = vadd.xlane.f32.xlu0 %v1575_v36 }
 0x357   : > { %v1347_v24 = vadd.f32 %v3019_v58, %v1346_v50 }
 0x358   : > { %v3146_v34 = vpop.permute.xlu2 %1740 }
 0x359   : > { %v1373_v11 = vmax.f32 %v1347_v24, 0.0 }
 0x35b   : > { %v1384_v57 = vpack.c.bf16 %v1373_v11, %v1372_v55  ;;  %v3188_v60 = vpop.xlane.xlu0 %1646 }
 0x35c   : > { %1736 = vrot.lane.b32.xlu1 %v2669_v18, %s2271_s24  ;;  %v1436_v62 = vpop.f32.mrf.mxu0  ;;  %v1590_v18 = vsel %vm479_vm0, %v3101_v8, 0.0  ;;  %v1517_v8 = vpop.permute.xlu1 %1516 }
 0x35d   : > { %v1437_v20 = vadd.f32 %v3151_v12, %v1436_v62  ;;  %2030 = vmatmul.msk.bf16.gmra.mxu0 %vm1400_vm5, %v1384_v57  ;;  %1582 = vadd.xlane.f32.xlu2 %v1581_v23  ;;  %v1569_v37 = vsel %vm479_vm0, %v1517_v8, 0.0 }
 0x35e   : > { %v1349_v56 = vpop.f32.mrf.mxu3  ;;  %1585 = vadd.xlane.f32.xlu0 %v1584_v0 }
 0x35f   : > { %v3161_v19 = vsel %vm1400_vm5, %v1437_v20, %v1733_v6  ;;  %v1350_v40 = vadd.f32 %v3019_v58, %v1349_v56 }
 0x360   : > { %v3163_v44 = vpop.permute.xlu2 %1746 }
 0x361   : > { %v1374_v39 = vmax.f32 %v1350_v40, 0.0 }
 0x364   : > { %1742 = vrot.lane.b32.xlu1 %v2712_v48, %s2271_s24  ;;  %v1523_v3 = vpop.permute.xlu1 %1522  ;;  %v1439_v5 = vpop.f32.mrf.mxu0 }
 0x365   : > { %1591 = vadd.xlane.f32.xlu2 %v1590_v18  ;;  %v1440_v20 = vadd.f32 %v3151_v12, %v1439_v5 }
 0x366   : > { %v1351_v15 = vpop.f32.mrf.mxu3  ;;  %1594 = vadd.xlane.f32.xlu0 %v1593_v1 }
 0x367   : > { %v1352_v63 = vadd.f32 %v3019_v58, %v1351_v15 }
 0x368   : > { %v3173_v31 = vpop.permute.xlu2 %1752 }
 0x369   : > { %v1375_v25 = vmax.f32 %v1352_v63, 0.0 }
 0x36b   : > { %v1385_v46 = vpack.c.bf16 %v1375_v25, %v1374_v39  ;;  %v1435_v39 = vadd.f32 %v3151_v12, %v3140_v61 }
 0x36c   : > { %1748 = vrot.lane.b32.xlu1 %v2880_v7, %s2271_s24  ;;  %v1529_v35 = vpop.permute.xlu1 %1528  ;;  %v1441_v6 = vpop.f32.mrf.mxu0 }
 0x36d   : > { %2031 = vmatmul.msk.bf16.gmra.mxu0 %vm1400_vm5, %v1385_v46 }
 0x36e   : > { %v1354_v48 = vpop.f32.mrf.mxu3 }
 0x36f   : > { %v1355_v47 = vadd.f32 %v3019_v58, %v1354_v48 }
 0x370   : > { %v1537_v26 = vpop.permute.xlu2 %1536 }
 0x371   : > { %v1599_v17 = vsel %vm479_vm0, %v1537_v26, 0.0  ;;  %v1376_v54 = vmax.f32 %v1355_v47, 0.0 }
 0x372   : > { %1600 = vadd.xlane.f32.xlu2 %v1599_v17 }
 0x374   : > { %1754 = vrot.lane.b32.xlu1 %v2931_v22, %s2271_s24  ;;  %v3190_v22 = vpop.xlane.xlu0 %1655  ;;  %v1535_v10 = vpop.permute.xlu1 %1534 }
 0x375   : > { %v1444_v36 = vpop.f32.mrf.mxu0  ;;  %v1596_v11 = vsel %vm479_vm0, %v1535_v10, 0.0 }
 0x376   : > { %v1356_v42 = vpop.f32.mrf.mxu3  ;;  %v1445_v61 = vadd.f32 %v3151_v12, %v1444_v36 }
 0x377   : > { %v1357_v13 = vadd.f32 %v3019_v58, %v1356_v42 }
 0x379   : > { %v1377_v7 = vmax.f32 %v1357_v13, 0.0 }
 0x37a   : > { %1756 = vrot.lane.b32.xlu0 %v2947_v4, %s2271_s24  ;;  %v1557_v4 = vsel %vm479_vm0, %v3085_v45, 0.0  ;;  %v1587_v45 = vsel %vm479_vm0, %v1529_v35, 0.0 }
 0x37b   : > { %v1386_v30 = vpack.c.bf16 %v1377_v7, %v1376_v54 }
 0x37c   : > { %v3194_v51 = vpop.xlane.xlu0 %1664 }
 0x37d   : > { %2032 = vmatmul.msk.bf16.gmra.mxu0 %vm1400_vm5, %v1386_v30  ;;  %v3217_v18 = vpop.f32.mrf.mxu0 }
 0x384   : > { %v1735_v28 = vpop.permute.xlu0 %1734 }
 0x385   : > { %v1780_v1 = vsel %vm1400_vm5, %v1440_v20, %v1735_v28 }
 0x38a   : > { %1758 = vrot.lane.b32.xlu2 %v2954_v9, %s2271_s24  ;;  %v1578_v9 = vsel %vm479_vm0, %v1523_v3, 0.0 }
 0x38c   : > { %v1739_v53 = vpop.permute.xlu0 %1738 }
 0x38d   : > { %v1782_v30 = vsel %vm1400_vm5, %v1445_v61, %v1739_v53 }
 0x38e   : > { %v3196_v41 = vpop.xlane.xlu1 %1622 }
 0x394   : > { %v3202_v49 = vpop.permute.xlu0 %1744 }
 0x396   : > { %v1632_v16 = vpop.xlane.xlu1 %1631 }
 0x39c   : > { %v3207_v24 = vpop.permute.xlu0 %1750 }
 0x39e   : > { %1558 = vadd.xlane.f32.xlu1 %v1557_v4  ;;  %v1641_v59 = vpop.xlane.xlu1 %1640 }
 0x3a6   : > { %1570 = vadd.xlane.f32.xlu1 %v1569_v37  ;;  %v3204_v27 = vpop.xlane.xlu1 %1649 }
 0x3ae   : > { %1579 = vadd.xlane.f32.xlu1 %v1578_v9  ;;  %v3212_v57 = vpop.xlane.xlu1 %1658 }
 0x3b6   : > { %1588 = vadd.xlane.f32.xlu1 %v1587_v45 }
 0x3b8   : > { %v1562_v50 = vpop.xlane.xlu2 %1561 }
 0x3b9   : > { %v1668_v55 = vadd.f32 %v3108_v14, %v1562_v50 }
 0x3bb   : > { %2175 = vrcp.f32 %v1668_v55 }
 0x3be   : > { %1597 = vadd.xlane.f32.xlu1 %v1596_v11 }
 0x3c0   : > { %v1565_v62 = vpop.xlane.xlu2 %1564 }
 0x3c1   : > { %v2176_v23 = vpop.eup %2175  ;;  %v1669_v0 = vadd.f32 %v1629_v29, %v1565_v62  ;;  %v1568_v56 = vpop.xlane.xlu0 %1567 }
 0x3c2   : > { %v1700_v40 = vmul.f32 %v2176_v23, %v1562_v50  ;;  %v1670_v14 = vadd.f32 %v1632_v16, %v1568_v56 }
 0x3c3   : > { %v1359_v15 = vpop.f32.mrf.mxu3 }
 0x3c4   : > { %v1797_v63 = vsel %vm1794_vm6, %v1780_v1, %v1700_v40  ;;  %2177 = vrcp.f32 %v1670_v14  ;;  %v1360_v47 = vadd.f32 %v3019_v58, %v1359_v15 }
 0x3c5   : > { %1813 = vst [vmem:[%s3223_s14 + $0x10] sm:$0xff] %v1797_v63  ;;  %2179 = vrcp.f32 %v1669_v0 }
 0x3c6   : > { %v1731_v25 = vpop.permute.xlu1 %1730  ;;  %v1378_v28 = vmax.f32 %v1360_v47, 0.0 }
 0x3c7   : > { %v1778_v29 = vsel %vm1400_vm5, %v1435_v39, %v1731_v25 }
 0x3c8   : > { %v1795_v46 = vsel %vm1794_vm6, %v1778_v29, %v3134_v21  ;;  %v1574_v48 = vpop.xlane.xlu2 %1573 }
 0x3c9   : > { %1811 = vst [vmem:[%s3223_s14] sm:$0xff] %v1795_v46  ;;  %v1672_v8 = vadd.f32 %v3181_v52, %v1574_v48  ;;  %v1577_v26 = vpop.xlane.xlu0 %1576  ;;  %v1442_v52 = vadd.f32 %v3151_v12, %v1441_v6 }
 0x3ca   : > { %v2178_v17 = vpop.eup %2177  ;;  %v1673_v42 = vadd.f32 %v1641_v59, %v1577_v26  ;;  %v1449_v13 = vpop.f32.mrf.mxu0 }
 0x3cb   : > { %v2180_v54 = vpop.eup %2179  ;;  %v1702_v7 = vmul.f32 %v2178_v17, %v1568_v56  ;;  %v1361_v3 = vpop.f32.mrf.mxu3  ;;  %v1450_v50 = vadd.f32 %v3151_v12, %v1449_v13 }
 0x3cc   : > { %2181 = vrcp.f32 %v1673_v42  ;;  %v1362_v21 = vadd.f32 %v3019_v58, %v1361_v3  ;;  %v1701_v10 = vmul.f32 %v2180_v54, %v1565_v62 }
 0x3cd   : > { %v1799_v35 = vsel %vm1794_vm6, %v1782_v30, %v1702_v7  ;;  %2183 = vrcp.f32 %v1672_v8 }
 0x3ce   : > { %1815 = vst [vmem:[%s3223_s14 + $0x20] sm:$0xff] %v1799_v35  ;;  %v1379_v4 = vmax.f32 %v1362_v21, 0.0  ;;  %v1737_v16 = vpop.permute.xlu1 %1736 }
 0x3cf   : > { %v1781_v5 = vsel %vm1400_vm5, %v1442_v52, %v1737_v16 }
 0x3d0   : > { %v1387_v37 = vpack.c.bf16 %v1379_v4, %v1378_v28  ;;  %v1798_v59 = vsel %vm1794_vm6, %v1781_v5, %v1701_v10  ;;  %v1583_v36 = vpop.xlane.xlu2 %1582 }
 0x3d1   : > { %1814 = vst [vmem:[%s3223_s14 + $0x18] sm:$0xff] %v1798_v59  ;;  %v1675_v20 = vadd.f32 %v3188_v60, %v1583_v36  ;;  %v1586_v14 = vpop.xlane.xlu0 %1585 }
 0x3d2   : > { %v2182_v53 = vpop.eup %2181  ;;  %v1451_v9 = vpop.f32.mrf.mxu0  ;;  %2033 = vmatmul.msk.bf16.gmra.mxu0 %vm1400_vm5, %v1387_v37 }
 0x3d3   : > { %v2184_v58 = vpop.eup %2183  ;;  %v1705_v6 = vmul.f32 %v2182_v53, %v1577_v26  ;;  %v1452_v45 = vadd.f32 %v3151_v12, %v1451_v9  ;;  %2185 = vrcp.f32 %v1675_v20 }
 0x3d4   : > { %v1704_v11 = vmul.f32 %v2184_v58, %v1574_v48 }
 0x3d5   : > { %v1785_v55 = vsel %vm1400_vm5, %v1452_v45, %v3202_v49  ;;  %v1676_v49 = vadd.f32 %v3204_v27, %v1586_v14  ;;  %v1447_v45 = vadd.f32 %v3151_v12, %v3217_v18 }
 0x3d6   : > { %v1802_v62 = vsel %vm1794_vm6, %v1785_v55, %v1705_v6  ;;  %v1743_v23 = vpop.permute.xlu1 %1742 }
 0x3d7   : > { %1818 = vst [vmem:[%s3223_s14 + $0x38] sm:$0xff] %v1802_v62  ;;  %v1784_v0 = vsel %vm1400_vm5, %v1450_v50, %v1743_v23  ;;  %1760 = vrot.lane.b32.xlu1 %v3005_v2, %s2271_s24  ;;  %2187 = vrcp.f32 %v1676_v49  ;;  %s1840_s24 = sshll.u32 %s3223_s14, 4  ;;  %s1841_s24 = int_to_ptr.vmem [resolvable:$true] %s1840_s24 }
 0x3d8   : > { %v1801_v56 = vsel %vm1794_vm6, %v1784_v0, %v1704_v11  ;;  %v1592_v26 = vpop.xlane.xlu2 %1591  ;;  %v1783_v11 = vsel %vm1400_vm5, %v1447_v45, %v3146_v34 }
 0x3d9   : > { %1817 = vst [vmem:[%s3223_s14 + $0x30] sm:$0xff] %v1801_v56  ;;  %v2186_v1 = vpop.eup %2185  ;;  %v1678_v61 = vadd.f32 %v3190_v22, %v1592_v26  ;;  %v1595_v42 = vpop.xlane.xlu0 %1594 }
 0x3da   : > { %v1454_v40 = vpop.f32.mrf.mxu0  ;;  %v1707_v63 = vmul.f32 %v2186_v1, %v1583_v36  ;;  %v1679_v13 = vadd.f32 %v3212_v57, %v1595_v42 }
 0x3db   : > { %2189 = vrcp.f32 %v1678_v61 }
 0x3dc   : > { %2191 = vrcp.f32 %v1679_v13 }
 0x3dd   : > { %v2188_v29 = vpop.eup %2187 }
 0x3de   : > { %v1749_v39 = vpop.permute.xlu1 %1748  ;;  %v1708_v8 = vmul.f32 %v2188_v29, %v1586_v14 }
 0x3e1   : > { %v2190_v54 = vpop.eup %2189 }
 0x3e2   : > { %v1456_v15 = vpop.f32.mrf.mxu0  ;;  %v1710_v30 = vmul.f32 %v2190_v54, %v1592_v26  ;;  %v2192_v22 = vpop.eup %2191 }
 0x3e3   : > { %v1457_v60 = vadd.f32 %v3151_v12, %v1456_v15  ;;  %v1711_v28 = vmul.f32 %v2192_v22, %v1595_v42 }
 0x3e5   : > { %v1787_v25 = vsel %vm1400_vm5, %v1457_v60, %v1749_v39 }
 0x3e6   : > { %v1804_v2 = vsel %vm1794_vm6, %v1787_v25, %v1707_v63  ;;  %v1755_v21 = vpop.permute.xlu1 %1754 }
 0x3e7   : > { %1820 = vst [vmem:[%s3223_s14 + $0x48] sm:$0xff] %v1804_v2 }
 0x3ea   : > { %v1459_v46 = vpop.f32.mrf.mxu0 }
 0x3eb   : > { %v1460_v48 = vadd.f32 %v3151_v12, %v1459_v46 }
 0x3ec   : > { %v1757_v57 = vpop.permute.xlu0 %1756 }
 0x3ed   : > { %v1788_v27 = vsel %vm1400_vm5, %v1460_v48, %v3207_v24 }
 0x3ee   : > { %v1805_v17 = vsel %vm1794_vm6, %v1788_v27, %v1708_v8 }
 0x3ef   : > { %1821 = vst [vmem:[%s3223_s14 + $0x50] sm:$0xff] %v1805_v17 }
 0x3f2   : > { %v1461_v47 = vpop.f32.mrf.mxu0 }
 0x3f3   : > { %v1462_v34 = vadd.f32 %v3151_v12, %v1461_v47 }
 0x3fa   : > { %v1464_v7 = vpop.f32.mrf.mxu0 }
 0x3fb   : > { %v1465_v3 = vadd.f32 %v3151_v12, %v1464_v7 }
 0x3fd   : > { %v1790_v24 = vsel %vm1400_vm5, %v1465_v3, %v1755_v21 }
 0x3fe   : > { %v1807_v52 = vsel %vm1794_vm6, %v1790_v24, %v1710_v30 }
 0x3ff   : > { %1823 = vst [vmem:[%s3223_s14 + $0x60] sm:$0xff] %v1807_v52 }
 0x402   : > { %v1466_v35 = vpop.f32.mrf.mxu0 }
 0x403   : > { %v1467_v10 = vadd.f32 %v3151_v12, %v1466_v35 }
 0x405   : > { %v1791_v4 = vsel %vm1400_vm5, %v1467_v10, %v1757_v57 }
 0x406   : > { %v1808_v16 = vsel %vm1794_vm6, %v1791_v4, %v1711_v28 }
 0x407   : > { %1824 = vst [vmem:[%s3223_s14 + $0x68] sm:$0xff] %v1808_v16 }
 0x411   : > { %v1559_v5 = vpop.xlane.xlu1 %1558 }
 0x412   : > { %v1667_v37 = vadd.f32 %v3196_v41, %v1559_v5 }
 0x414   : > { %2193 = vrcp.f32 %v1667_v37 }
 0x419   : > { %v1571_v59 = vpop.xlane.xlu1 %1570 }
 0x41a   : > { %v2194_v53 = vpop.eup %2193  ;;  %v1671_v9 = vadd.f32 %v3113_v33, %v1571_v59 }
 0x41b   : > { %v1699_v58 = vmul.f32 %v2194_v53, %v1559_v5 }
 0x41c   : > { %2195 = vrcp.f32 %v1671_v9 }
 0x41d   : > { %v1796_v6 = vsel %vm1794_vm6, %v3161_v19, %v1699_v58  ;;  %v1455_v19 = vadd.f32 %v3151_v12, %v1454_v40  ;;  %v1789_v40 = vsel %vm1400_vm5, %v1462_v34, %v3173_v31 }
 0x41e   : > { %1812 = vst [vmem:[%s3223_s14 + $0x8] sm:$0xff] %v1796_v6 }
 0x41f   : > { %v1786_v0 = vsel %vm1400_vm5, %v1455_v19, %v3163_v44  ;;  %v1601_v44 = vpop.xlane.xlu2 %1600 }
 0x420   : > { %v1681_v15 = vadd.f32 %v3194_v51, %v1601_v44 }
 0x421   : > { %v1580_v36 = vpop.xlane.xlu1 %1579 }
 0x422   : > { %v2196_v50 = vpop.eup %2195  ;;  %v1674_v41 = vadd.f32 %v3120_v32, %v1580_v36 }
 0x423   : > { %v1703_v55 = vmul.f32 %v2196_v50, %v1571_v59 }
 0x424   : > { %2197 = vrcp.f32 %v1674_v41 }
 0x425   : > { %v1800_v33 = vsel %vm1794_vm6, %v1783_v11, %v1703_v55 }
 0x426   : > { %1816 = vst [vmem:[%s3223_s14 + $0x28] sm:$0xff] %v1800_v33 }
 0x427   : > { %v1759_v25 = vpop.permute.xlu2 %1758 }
 0x429   : > { %v1589_v62 = vpop.xlane.xlu1 %1588 }
 0x42a   : > { %v2198_v23 = vpop.eup %2197  ;;  %v1677_v18 = vadd.f32 %v3126_v38, %v1589_v62 }
 0x42b   : > { %v1706_v20 = vmul.f32 %v2198_v23, %v1580_v36 }
 0x42c   : > { %2199 = vrcp.f32 %v1677_v18 }
 0x42d   : > { %v1803_v32 = vsel %vm1794_vm6, %v1786_v0, %v1706_v20 }
 0x42e   : > { %1819 = vst [vmem:[%s3223_s14 + $0x40] sm:$0xff] %v1803_v32 }
 0x431   : > { %v1598_v38 = vpop.xlane.xlu1 %1597 }
 0x432   : > { %v2200_v56 = vpop.eup %2199  ;;  %v1680_v1 = vadd.f32 %v3131_v43, %v1598_v38 }
 0x433   : > { %v1709_v14 = vmul.f32 %v2200_v56, %v1589_v62 }
 0x434   : > { %2201 = vrcp.f32 %v1680_v1 }
 0x435   : > { %v1806_v49 = vsel %vm1794_vm6, %v1789_v40, %v1709_v14  ;;  %2203 = vrcp.f32 %v1681_v15 }
 0x436   : > { %1822 = vst [vmem:[%s3223_s14 + $0x58] sm:$0xff] %v1806_v49 }
 0x43a   : > { %v2202_v60 = vpop.eup %2201 }
 0x43b   : > { %v1712_v2 = vmul.f32 %v2202_v60, %v1598_v38  ;;  %v2204_v43 = vpop.eup %2203 }
 0x43c   : > { %v1713_v48 = vmul.f32 %v2204_v43, %v1601_v44 }
 0x449   : > { %v1761_v8 = vpop.permute.xlu1 %1760 }
 0x44f   : > { %v1469_v63 = vpop.f32.mrf.mxu0 }
 0x450   : > { %v1470_v39 = vadd.f32 %v3151_v12, %v1469_v63 }
 0x452   : > { %v1792_v31 = vsel %vm1400_vm5, %v1470_v39, %v1759_v25 }
 0x453   : > { %v1809_v29 = vsel %vm1794_vm6, %v1792_v31, %v1712_v2 }
 0x454   : > { %1825 = vst [vmem:[%s3223_s14 + $0x70] sm:$0xff] %v1809_v29 }
 0x457   : > { %v1471_v51 = vpop.f32.mrf.mxu0 }
 0x458   : > { %v1472_v46 = vadd.f32 %v3151_v12, %v1471_v51 }
 0x45a   : > { %v1793_v26 = vsel %vm1400_vm5, %v1472_v46, %v1761_v8 }
 0x45b   : > { %v1810_v27 = vsel %vm1794_vm6, %v1793_v26, %v1713_v48 }
 0x45c   : > { %1826 = vst [vmem:[%s3223_s14 + $0x78] sm:$0xff] %v1810_v27 }
 0x45d   : > { %2232 = shalt.err (!%p2229_p3)
}
 0x45e   : > { %s2272_s12 = smov 128   ;;  %s2273_s14 = smov 8  }
 0x45f   : > { %2061 = dma.vmem_to_hbm [thread:$0]  (%p2372_p5), %s1841_s24, 2048, %s1843_s25, %s1828_s21, %s2272_s12, %s2272_s12, %s2273_s14  }
 0x460 PF: > { %p2067_p4 = scmp.ge.s32.totalorder %s2267_s20, 2  ;;  %s1857_s16 = sand.u32 1, %s2255_s17  }
 0x461   : > { %s1858_s0 = scalar_lea.sflag [#allocation3], %s1857_s16 }
 0x462   : > { %p2064_p7 = pnand %p2067_p4, %p2376_p6 }
 0x464   : > { %p2065_p8 = pneg %p2064_p7 }
 0x466   : > { %2250 = dma.done.wait (%p2065_p8), %s1858_s0, 2048  }
 0x467   : > { %2252 = vsyncadd (%p2065_p8), %s1858_s0, 4294965248  ;;  %p21_p9 = scmp.ge.s32.totalorder %s2359_s23, 4   ;;  %s3371_s17 = smov %s2259_s18 }
 0x468   : > { %s3372_s18 = smov %s2263_s19  ;;  %s3373_s19 = smov %s2370_s26 }
 0x469   : > { %s3374_s20 = smov %s2359_s23  ;;  %23 = sbr.rel (!%p21_p9) target bundleno = 5 (0x5), region = 102 }
 0x46e   :  { %1864 = vsyncpa [#allocation3], 1 }
 0x46f   :  { %1866 = vsyncpa [#allocation3 + $0x1], 1 }

</bundles_post_ra>
